<compile_context>
chip_gen: v7x
topology: tpu7x:2x2x1
jax: 0.10.0
libtpu: 0.0.40
codegen_flags: <defaults>
</compile_context>

<pallas_src>
import functools

import jax
import jax.numpy as jnp
from jax import lax
from jax.experimental import pallas as pl
from jax.experimental.pallas import tpu as pltpu

EPS = 1e-5  # nn.BatchNorm2d default

_TAPS = tuple((dy, dx) for dy in range(3) for dx in range(3))


# ----------------------------------------------------------------------------
# VMEM budgeting helpers (generation-aware)
# ----------------------------------------------------------------------------
def _vmem_cap_bytes():
    try:
        return int(pltpu.get_tpu_info().vmem_capacity_bytes)
    except Exception:      # conservative fallback = v7x per-TensorCore VMEM
        return 64 * 2**20


def _conv_working_set(C, Cout, HW, HWt, n_rt, lpad, use_patch, patch_bytes):
    ws = 2 * C * HW * 4                       # x block (f32, double buffered)
    ws += 2 * C * HW * 2                      # y_prev block (bf16, double buffered)
    ws += 2 * Cout * HWt * 2                  # y output block (bf16, double buffered)
    ws += n_rt * C * (HWt + 2 * lpad) * 2     # resident haloed row slabs (bf16)
    if use_patch:
        ws += 9 * C * HWt * patch_bytes       # im2col buffer
    ws += 2 * Cout * 9 * C * 2 + (2 * C + 2 * Cout) * 4 * 4   # weights / vectors
    ws += C * (HW + 2 * lpad) * 6             # once-per-batch inp temporaries
    ws += 4 * C * HWt * 4                     # per-tap temporaries
    return ws


def _vmem_limit(working_set_bytes, vmem_cap):
    want = int(working_set_bytes * 1.5) + (2 << 20)
    return int(min(max(want, 16 << 20), int(vmem_cap * 0.9)))


def _pick_row_tile(H, W, C, Cout, vmem_cap):
    """Largest row tile whose working set fits ~half of VMEM, preferring >=2
    row tiles per batch element so the BlockSpec pipeline has steps to overlap."""
    HW = H * W
    lpad = pl.cdiv(W + 1, 128) * 128
    cands = [h for h in range(1, H + 1)
             if H % h == 0 and ((h * W) % 128 == 0 or h == H)]
    budget = vmem_cap // 2

    def est(h):
        return _conv_working_set(C, Cout, HW, h * W, H // h, lpad, True, 4)

    fitting = [h for h in cands if est(h) <= budget]
    if not fitting:
        # TODO(synk): manual-DMA halo streaming for huge images (see header).
        fitting = [min(cands)]
    preferred = [h for h in fitting if h <= max(1, H // 2)]
    return max(preferred) if preferred else min(fitting)


# ----------------------------------------------------------------------------
# Kernel: fused  inp = x + relu(scale*y_prev + shift)   (prev BN+ReLU + skip)
#         y    = Conv3x3(inp) + bias                    (im2col or 9-tap MXU)
#         packed per-(batch, row-tile) partial BN stats
# Grid = (N, n_row_tiles); haloed row slabs populated once per batch element.
# ----------------------------------------------------------------------------
def _conv3x3_kernel(*refs, width, first, use_patch):
    if first:
        x_ref, w_ref, b_ref = refs[:3]
        yprev_ref = scale_ref = shift_ref = None
        refs = refs[3:]
    else:
        x_ref, yprev_ref, scale_ref, shift_ref, w_ref, b_ref = refs[:6]
        refs = refs[6:]
    y_ref, stats_ref = refs[:2]
    if use_patch:
        xext_ref, patch_ref = refs[2:]
    else:
        (xext_ref,) = refs[2:]
        patch_ref = None

    rt = pl.program_id(1)                      # row-tile index (innermost axis)
    C = x_ref.shape[1]
    HW = x_ref.shape[2]
    Cout = y_ref.shape[1]
    HWt = y_ref.shape[2]                       # flattened row-tile extent
    n_rt = xext_ref.shape[0]
    slab_w = xext_ref.shape[2]
    lpad = (slab_w - HWt) // 2                 # lane-aligned halo (>= W+1)

    # ---- once per batch element: fuse previous BN+ReLU + skip add, then
    # scatter the flattened rows into zero-haloed per-row-tile slabs (bf16).
    @pl.when(rt == 0)
    def _():
        x = x_ref[0].astype(jnp.float32)                         # (C, HW)
        if first:
            inp = x                                              # x1 = conv(x)
        else:
            yp = yprev_ref[0].astype(jnp.float32)
            inp = x + jnp.maximum(yp * scale_ref[...] + shift_ref[...], 0.0)
        inp = inp.astype(xext_ref.dtype)                         # cast once
        for r in range(n_rt):                                    # static unroll
            lo = r * HWt - lpad
            hi = r * HWt + HWt + lpad
            left = max(0, -lo)
            right = max(0, hi - HW)
            pieces = []
            if left:
                pieces.append(jnp.zeros((C, left), xext_ref.dtype))
            pieces.append(inp[:, max(lo, 0):min(hi, HW)])
            if right:
                pieces.append(jnp.zeros((C, right), xext_ref.dtype))
            slab = pieces[0] if len(pieces) == 1 else jnp.concatenate(pieces, axis=1)
            xext_ref[r] = slab

    # ---- 3x3 taps for this row tile: static lane slices of the resident slab
    # plus a row-wrap mask on the first/last columns.
    col = lax.broadcasted_iota(jnp.int32, (1, HWt), 1) % width
    not_first_col = col > 0
    not_last_col = col < (width - 1)

    def tap_slice(t_idx):
        dy, dx = _TAPS[t_idx]
        off = lpad + (dy - 1) * width + (dx - 1)
        tap = xext_ref[rt, :, off:off + HWt]                     # (C, HWt) bf16
        if dx == 0:
            tap = jnp.where(not_first_col, tap, jnp.zeros_like(tap))
        elif dx == 2:
            tap = jnp.where(not_last_col, tap, jnp.zeros_like(tap))
        return tap

    if use_patch:
        # small C: one im2col MXU matmul  (Cout, 9C) x (9C, HWt)
        for t_idx in range(9):
            patch_ref[t_idx * C:(t_idx + 1) * C, :] = (
                tap_slice(t_idx).astype(patch_ref.dtype))
        y = jnp.dot(w_ref[...], patch_ref[...].astype(jnp.bfloat16),
                    preferred_element_type=jnp.float32)
    else:
        # large C (>= 128): skip the im2col buffer, accumulate 9 matmuls
        y = jnp.zeros((Cout, HWt), jnp.float32)
        for t_idx in range(9):
            y = y + jnp.dot(w_ref[:, t_idx * C:(t_idx + 1) * C], tap_slice(t_idx),
                            preferred_element_type=jnp.float32)

    y = y + b_ref[...]                                           # (Cout, 1) bias
    y_ref[...] = y.astype(y_ref.dtype)[None]                     # bf16 writeback

    # packed lane-dense per-(batch, row-tile) partial BN stats: (Cout, 2)
    s = jnp.sum(y, axis=1, keepdims=True)
    q = jnp.sum(y * y, axis=1, keepdims=True)
    stats_ref[...] = jnp.concatenate([s, q], axis=1)[None, None]


def _conv3x3_bn_stats(x_flat, yprev, scale, shift, w_bf16, b_col, *,
                      width, row_tile, vmem_cap):
    N, C, HW = x_flat.shape
    Cout = w_bf16.shape[0]
    H = HW // width
    Ht = row_tile
    n_rt = H // Ht
    HWt = Ht * width
    lpad = pl.cdiv(width + 1, 128) * 128
    first = yprev is None
    use_patch = C < 128
    # bf16 im2col buffer only when the per-tap sublane offset (C rows) stays
    # aligned to the bf16 packing (16); otherwise keep f32 and cast at the dot.
    patch_dtype = jnp.bfloat16 if C % 16 == 0 else jnp.float32

    in_specs = [pl.BlockSpec((1, C, HW), lambda n, r: (n, 0, 0))]   # x, resident
    inputs = [x_flat]
    if not first:
        in_specs += [
            pl.BlockSpec((1, C, HW), lambda n, r: (n, 0, 0)),       # y_prev (bf16)
            pl.BlockSpec((C, 1), lambda n, r: (0, 0)),              # prev BN scale
            pl.BlockSpec((C, 1), lambda n, r: (0, 0)),              # prev BN shift
        ]
        inputs += [yprev, scale, shift]
    in_specs += [
        pl.BlockSpec((Cout, 9 * C), lambda n, r: (0, 0)),           # im2col weights
        pl.BlockSpec((Cout, 1), lambda n, r: (0, 0)),               # bias
    ]
    inputs += [w_bf16, b_col]

    scratch = [pltpu.VMEM((n_rt, C, HWt + 2 * lpad), jnp.bfloat16)]  # haloed slabs
    if use_patch:
        scratch.append(pltpu.VMEM((9 * C, HWt), patch_dtype))        # im2col buffer

    ws = _conv_working_set(C, Cout, HW, HWt, n_rt, lpad, use_patch,
                           jnp.dtype(patch_dtype).itemsize)
    kernel = functools.partial(_conv3x3_kernel, width=width, first=first,
                               use_patch=use_patch)
    y, stats = pl.pallas_call(
        kernel,
        out_shape=(
            jax.ShapeDtypeStruct((N, Cout, HW), jnp.bfloat16),        # raw conv out
            jax.ShapeDtypeStruct((N, n_rt, Cout, 2), jnp.float32),    # packed stats
        ),
        grid_spec=pltpu.PrefetchScalarGridSpec(
            num_scalar_prefetch=0,
            grid=(N, n_rt),
            in_specs=in_specs,
            out_specs=[
                pl.BlockSpec((1, Cout, HWt), lambda n, r: (n, 0, r)),
                pl.BlockSpec((1, 1, Cout, 2), lambda n, r: (n, r, 0, 0)),
            ],
            scratch_shapes=scratch,
        ),
        compiler_params=pltpu.CompilerParams(
            dimension_semantics=("parallel", "arbitrary"),
            vmem_limit_bytes=_vmem_limit(ws, vmem_cap),
        ),
    )(*inputs)
    return y, stats


# ----------------------------------------------------------------------------
# Standalone BN affine + ReLU for the final application's (bf16) output.
# ----------------------------------------------------------------------------
def _bn_relu_kernel(y_ref, scale_ref, shift_ref, o_ref):
    y = y_ref[0].astype(jnp.float32)                                # (C, HW)
    o_ref[...] = jnp.maximum(y * scale_ref[...] + shift_ref[...], 0.0)[None]


def _bn_relu(y_flat, scale, shift, vmem_cap):
    N, C, HW = y_flat.shape
    return pl.pallas_call(
        _bn_relu_kernel,
        out_shape=jax.ShapeDtypeStruct((N, C, HW), jnp.float32),
        grid_spec=pltpu.PrefetchScalarGridSpec(
            num_scalar_prefetch=0,
            grid=(N,),
            in_specs=[
                pl.BlockSpec((1, C, HW), lambda n: (n, 0, 0)),
                pl.BlockSpec((C, 1), lambda n: (0, 0)),
                pl.BlockSpec((C, 1), lambda n: (0, 0)),
            ],
            out_specs=pl.BlockSpec((1, C, HW), lambda n: (n, 0, 0)),
        ),
        compiler_params=pltpu.CompilerParams(
            dimension_semantics=("parallel",),
            vmem_limit_bytes=_vmem_limit(4 * C * HW * 4, vmem_cap),
        ),
    )(y_flat, scale, shift)


# ----------------------------------------------------------------------------
# Recurrent_block forward (training-mode BatchNorm: batch stats, biased var).
# ----------------------------------------------------------------------------
def _bn_scale_shift(stats, count, gamma, beta):
    # TODO(synk): combine the per-(batch, row-tile) partials Welford-style for
    # very large N*H*W; E[y^2]-E[y]^2 on f32 partial sums is fine at these sizes.
    tot = jnp.sum(stats, axis=(0, 1))                       # (Cout, 2)
    mean = tot[:, 0] / count
    var = jnp.maximum(tot[:, 1] / count - mean * mean, 0.0)
    inv = gamma * lax.rsqrt(var + EPS)
    return inv.reshape(-1, 1), (beta - mean * inv).reshape(-1, 1)


def recurrent_block_forward(x_nchw, params, t=2):
    assert t >= 1
    N, C, H, W = x_nchw.shape
    HW = H * W
    count = float(N * HW)

    w = params["w"]                                   # (Cout=C, Cin=C, 3, 3) OIHW
    Cout = w.shape[0]
    # im2col weight layout: column = (kh*3 + kw)*Cin + cin  (bf16 MXU operand)
    w_bf16 = jnp.transpose(w, (0, 2, 3, 1)).reshape(Cout, 9 * C).astype(jnp.bfloat16)
    b_col = params["b"].reshape(Cout, 1).astype(jnp.float32)
    gamma = params["gamma"].astype(jnp.float32)
    beta = params["beta"].astype(jnp.float32)

    x_flat = x_nchw.reshape(N, C, HW)                 # free: stays NCHW row-major

    vmem_cap = _vmem_cap_bytes()
    row_tile = _pick_row_tile(H, W, C, Cout, vmem_cap)

    def conv_step(yprev, scale, shift):
        y, stats = _conv3x3_bn_stats(x_flat, yprev, scale, shift, w_bf16, b_col,
                                     width=W, row_tile=row_tile, vmem_cap=vmem_cap)
        new_scale, new_shift = _bn_scale_shift(stats, count, gamma, beta)
        return y, new_scale, new_shift

    # i == 0: x1 = conv(x)  (specialized kernel: no y_prev fetch, no fused BN)
    y1, scale, shift = conv_step(None, None, None)
    for _ in range(t):
        # x1 = conv(x + x1)  (prev BN+ReLU + skip add fused into the conv input)
        y1, scale, shift = conv_step(y1, scale, shift)

    out_flat = _bn_relu(y1, scale, shift, vmem_cap)   # final BN + ReLU
    return out_flat.reshape(N, C, H, W)


# ----------------------------------------------------------------------------
# Pure-JAX reference (mirrors the PyTorch module in training mode).
# ----------------------------------------------------------------------------
def recurrent_block_reference(x_nchw, params, t=2):
    w, b = params["w"], params["b"]
    gamma, beta = params["gamma"], params["beta"]

    def conv_bn_relu(inp):
        y = lax.conv_general_dilated(
            inp, w, window_strides=(1, 1), padding=((1, 1), (1, 1)),
            dimension_numbers=("NCHW", "OIHW", "NCHW"),
        ) + b[None, :, None, None]
        mean = jnp.mean(y, axis=(0, 2, 3), keepdims=True)
        var = jnp.mean((y - mean) ** 2, axis=(0, 2, 3), keepdims=True)
        yn = (y - mean) / jnp.sqrt(var + EPS)
        return jnp.maximum(yn * gamma[None, :, None, None]
                           + beta[None, :, None, None], 0.0)

    x1 = None
    for i in range(t):
        if i == 0:
            x1 = conv_bn_relu(x_nchw)
        x1 = conv_bn_relu(x_nchw + x1)
    return x1


if __name__ == "__main__":
    def run_case(N, C, H, W, t, key):
        kw, kb, kg, kbt, kx = jax.random.split(key, 5)
        params = {
            # Conv2d(ch_out, ch_out, 3, stride=1, padding=1, bias=True), OIHW.
            "w": jax.random.normal(kw, (C, C, 3, 3), jnp.float32) / (3.0 * C ** 0.5),
            "b": 0.1 * jax.random.normal(kb, (C,), jnp.float32),
            "gamma": 1.0 + 0.1 * jax.random.normal(kg, (C,), jnp.float32),
            "beta": 0.1 * jax.random.normal(kbt, (C,), jnp.float32),
        }
        x = jax.random.normal(kx, (N, C, H, W), jnp.float32)   # NCHW like PyTorch
        out = jax.jit(lambda v: recurrent_block_forward(v, params, t=t))(x)
        out = jax.block_until_ready(out)
        ref = recurrent_block_reference(x, params, t=t)
        assert out.shape == (N, C, H, W)
        err = float(jnp.max(jnp.abs(out - ref)))
        # bf16 MXU operands + bf16 intermediate activations vs. f32 reference.
        assert jnp.allclose(out, ref, rtol=3e-2, atol=3e-2), (N, C, H, W, t, err)

    key = jax.random.PRNGKey(0)
    k1, k2, k3 = jax.random.split(key, 3)
    run_case(2, 8, 16, 16, 2, k1)     # f32 im2col-buffer path (C % 16 != 0), 2 row tiles
    run_case(2, 16, 16, 16, 2, k2)    # bf16 im2col-buffer path (C % 16 == 0)
    run_case(2, 128, 16, 16, 2, k3)   # no-patch 9-matmul path (C >= 128)
    print("KERNEL_OK")
</pallas_src>

<mosaic_0001>
module attributes {stable_mosaic.version = 11 : i64} {
  func.func @_conv3x3_kernel(%arg0: i32, %arg1: i32, %arg2: memref<1x8x256xf32, #tpu.memory_space<vmem>>, %arg3: memref<8x72xbf16, #tpu.memory_space<vmem>>, %arg4: memref<8x1xf32, #tpu.memory_space<vmem>>, %arg5: memref<1x8x128xbf16, #tpu.memory_space<vmem>>, %arg6: memref<1x1x8x2xf32, #tpu.memory_space<vmem>>, %arg7: memref<2x8x384xbf16, #tpu.memory_space<vmem>>, %arg8: memref<72x128xf32, #tpu.memory_space<vmem>>) attributes {dimension_semantics = [#tpu.dimension_semantics<parallel>, #tpu.dimension_semantics<arbitrary>], iteration_bounds = array<i64: 2, 2>, scalar_prefetch = 0 : i64, scratch_operands = 2 : i64, tpu.core_type = #tpu.core_type<tc>, window_params = [{transform_indices = @transform_0, window_bounds = array<i64: 1, 8, 256>}, {pipeline_mode = #tpu.pipeline_mode<synchronous>, transform_indices = @transform_1, window_bounds = array<i64: 8, 72>}, {pipeline_mode = #tpu.pipeline_mode<synchronous>, transform_indices = @transform_2, window_bounds = array<i64: 8, 1>}, {transform_indices = @transform_3, window_bounds = array<i64: 1, 8, 128>}, {transform_indices = @transform_4, window_bounds = array<i64: 1, 1, 8, 2>}]} {
    %c0_i32 = arith.constant 0 : i32
    %0 = arith.cmpi eq, %arg1, %c0_i32 : i32
    %1 = arith.extui %0 : i1 to i32
    %c0_i32_0 = arith.constant 0 : i32
    %2 = arith.cmpi ne, %1, %c0_i32_0 : i32
    scf.if %2 {
      %c0_45 = arith.constant 0 : index
      %c0_46 = arith.constant 0 : index
      %c0_47 = arith.constant 0 : index
      %111 = vector.load %arg2[%c0_45, %c0_46, %c0_47] : memref<1x8x256xf32, #tpu.memory_space<vmem>>, vector<1x8x256xf32>
      %112 = vector.shape_cast %111 : vector<1x8x256xf32> to vector<8x256xf32>
      %113 = arith.truncf %112 : vector<8x256xf32> to vector<8x256xbf16>
      %cst_48 = arith.constant 0.000000e+00 : bf16
      %114 = vector.broadcast %cst_48 : bf16 to vector<8x128xbf16>
      %115 = tpu.concatenate %114, %113 in 1 : vector<8x128xbf16>, vector<8x256xbf16> -> vector<8x384xbf16>
      %c0_49 = arith.constant 0 : index
      %c0_50 = arith.constant 0 : index
      %c0_51 = arith.constant 0 : index
      %116 = vector.load %arg7[%c0_49, %c0_50, %c0_51] : memref<2x8x384xbf16, #tpu.memory_space<vmem>>, vector<1x8x384xbf16>
      %117 = vector.shape_cast %116 : vector<1x8x384xbf16> to vector<8x384xbf16>
      %118 = vector.shape_cast %115 : vector<8x384xbf16> to vector<1x8x384xbf16>
      tpu.vector_store %arg7[%c0_49, %c0_50, %c0_51], %118 {strides = array<i32>} : memref<2x8x384xbf16, #tpu.memory_space<vmem>>, vector<1x8x384xbf16>,
      %cst_52 = arith.constant 0.000000e+00 : bf16
      %119 = vector.broadcast %cst_52 : bf16 to vector<8x128xbf16>
      %120 = tpu.concatenate %113, %119 in 1 : vector<8x256xbf16>, vector<8x128xbf16> -> vector<8x384xbf16>
      %c1 = arith.constant 1 : index
      %c0_53 = arith.constant 0 : index
      %c0_54 = arith.constant 0 : index
      %121 = vector.load %arg7[%c1, %c0_53, %c0_54] : memref<2x8x384xbf16, #tpu.memory_space<vmem>>, vector<1x8x384xbf16>
      %122 = vector.shape_cast %121 : vector<1x8x384xbf16> to vector<8x384xbf16>
      %123 = vector.shape_cast %120 : vector<8x384xbf16> to vector<1x8x384xbf16>
      tpu.vector_store %arg7[%c1, %c0_53, %c0_54], %123 {strides = array<i32>} : memref<2x8x384xbf16, #tpu.memory_space<vmem>>, vector<1x8x384xbf16>,
    } else {
    }
    %3 = tpu.iota {dimensions = array<i32: 1>} : vector<1x128xi32>
    %c16_i32 = arith.constant 16 : i32
    %c0_i32_1 = arith.constant 0 : i32
    %4 = arith.cmpi eq, %c16_i32, %c0_i32_1 : i32
    %c1_i32 = arith.constant 1 : i32
    %5 = arith.select %4, %c1_i32, %c16_i32 : i32
    %6 = vector.broadcast %5 : i32 to vector<1x128xi32>
    %7 = arith.remsi %3, %6 : vector<1x128xi32>
    %c0_i32_2 = arith.constant 0 : i32
    %8 = vector.broadcast %c0_i32_2 : i32 to vector<1x128xi32>
    %9 = arith.cmpi ne, %7, %8 : vector<1x128xi32>
    %c0_i32_3 = arith.constant 0 : i32
    %10 = vector.broadcast %c0_i32_3 : i32 to vector<1x128xi32>
    %11 = arith.cmpi slt, %7, %10 : vector<1x128xi32>
    %c0_i32_4 = arith.constant 0 : i32
    %12 = arith.cmpi slt, %5, %c0_i32_4 : i32
    %13 = vector.broadcast %12 : i1 to vector<1x128xi1>
    %14 = vector.broadcast %13 : vector<1x128xi1> to vector<1x128xi1>
    %15 = arith.xori %11, %14 : vector<1x128xi1>
    %16 = arith.andi %15, %9 : vector<1x128xi1>
    %17 = vector.broadcast %5 : i32 to vector<1x128xi32>
    %18 = arith.addi %7, %17 : vector<1x128xi32>
    %19 = arith.select %16, %18, %7 : vector<1x128xi1>, vector<1x128xi32>
    %c0_i32_5 = arith.constant 0 : i32
    %20 = vector.broadcast %c0_i32_5 : i32 to vector<1x128xi32>
    %21 = arith.cmpi sgt, %19, %20 : vector<1x128xi32>
    %c15_i32 = arith.constant 15 : i32
    %22 = vector.broadcast %c15_i32 : i32 to vector<1x128xi32>
    %23 = arith.cmpi slt, %19, %22 : vector<1x128xi32>
    %24 = arith.index_cast %arg1 : i32 to index
    %c0 = arith.constant 0 : index
    %c111 = arith.constant 111 : index
    %25 = vector.load %arg7[%24, %c0, %c111] : memref<2x8x384xbf16, #tpu.memory_space<vmem>>, vector<1x8x128xbf16>
    %26 = vector.shape_cast %25 : vector<1x8x128xbf16> to vector<8x128xbf16>
    %cst = arith.constant 0.000000e+00 : bf16
    %27 = vector.broadcast %cst : bf16 to vector<8x128xbf16>
    %28 = vector.shape_cast %21 : vector<1x128xi1> to vector<1x128xi1>
    %29 = vector.broadcast %28 : vector<1x128xi1> to vector<8x128xi1>
    %30 = arith.select %29, %26, %27 : vector<8x128xi1>, vector<8x128xbf16>
    %31 = arith.extf %30 : vector<8x128xbf16> to vector<8x128xf32>
    %c0_6 = arith.constant 0 : index
    %c0_7 = arith.constant 0 : index
    %32 = vector.load %arg8[%c0_6, %c0_7] : memref<72x128xf32, #tpu.memory_space<vmem>>, vector<8x128xf32>
    tpu.vector_store %arg8[%c0_6, %c0_7], %31 {strides = array<i32>} : memref<72x128xf32, #tpu.memory_space<vmem>>, vector<8x128xf32>,
    %33 = arith.index_cast %arg1 : i32 to index
    %c0_8 = arith.constant 0 : index
    %c112 = arith.constant 112 : index
    %34 = vector.load %arg7[%33, %c0_8, %c112] : memref<2x8x384xbf16, #tpu.memory_space<vmem>>, vector<1x8x128xbf16>
    %35 = vector.shape_cast %34 : vector<1x8x128xbf16> to vector<8x128xbf16>
    %36 = arith.extf %35 : vector<8x128xbf16> to vector<8x128xf32>
    %c8 = arith.constant 8 : index
    %c0_9 = arith.constant 0 : index
    %37 = vector.load %arg8[%c8, %c0_9] : memref<72x128xf32, #tpu.memory_space<vmem>>, vector<8x128xf32>
    tpu.vector_store %arg8[%c8, %c0_9], %36 {strides = array<i32>} : memref<72x128xf32, #tpu.memory_space<vmem>>, vector<8x128xf32>,
    %38 = arith.index_cast %arg1 : i32 to index
    %c0_10 = arith.constant 0 : index
    %c113 = arith.constant 113 : index
    %39 = vector.load %arg7[%38, %c0_10, %c113] : memref<2x8x384xbf16, #tpu.memory_space<vmem>>, vector<1x8x128xbf16>
    %40 = vector.shape_cast %39 : vector<1x8x128xbf16> to vector<8x128xbf16>
    %cst_11 = arith.constant 0.000000e+00 : bf16
    %41 = vector.broadcast %cst_11 : bf16 to vector<8x128xbf16>
    %42 = vector.shape_cast %23 : vector<1x128xi1> to vector<1x128xi1>
    %43 = vector.broadcast %42 : vector<1x128xi1> to vector<8x128xi1>
    %44 = arith.select %43, %40, %41 : vector<8x128xi1>, vector<8x128xbf16>
    %45 = arith.extf %44 : vector<8x128xbf16> to vector<8x128xf32>
    %c16 = arith.constant 16 : index
    %c0_12 = arith.constant 0 : index
    %46 = vector.load %arg8[%c16, %c0_12] : memref<72x128xf32, #tpu.memory_space<vmem>>, vector<8x128xf32>
    tpu.vector_store %arg8[%c16, %c0_12], %45 {strides = array<i32>} : memref<72x128xf32, #tpu.memory_space<vmem>>, vector<8x128xf32>,
    %47 = arith.index_cast %arg1 : i32 to index
    %c0_13 = arith.constant 0 : index
    %c127 = arith.constant 127 : index
    %48 = vector.load %arg7[%47, %c0_13, %c127] : memref<2x8x384xbf16, #tpu.memory_space<vmem>>, vector<1x8x128xbf16>
    %49 = vector.shape_cast %48 : vector<1x8x128xbf16> to vector<8x128xbf16>
    %cst_14 = arith.constant 0.000000e+00 : bf16
    %50 = vector.broadcast %cst_14 : bf16 to vector<8x128xbf16>
    %51 = vector.shape_cast %21 : vector<1x128xi1> to vector<1x128xi1>
    %52 = vector.broadcast %51 : vector<1x128xi1> to vector<8x128xi1>
    %53 = arith.select %52, %49, %50 : vector<8x128xi1>, vector<8x128xbf16>
    %54 = arith.extf %53 : vector<8x128xbf16> to vector<8x128xf32>
    %c24 = arith.constant 24 : index
    %c0_15 = arith.constant 0 : index
    %55 = vector.load %arg8[%c24, %c0_15] : memref<72x128xf32, #tpu.memory_space<vmem>>, vector<8x128xf32>
    tpu.vector_store %arg8[%c24, %c0_15], %54 {strides = array<i32>} : memref<72x128xf32, #tpu.memory_space<vmem>>, vector<8x128xf32>,
    %56 = arith.index_cast %arg1 : i32 to index
    %c0_16 = arith.constant 0 : index
    %c128 = arith.constant 128 : index
    %57 = vector.load %arg7[%56, %c0_16, %c128] : memref<2x8x384xbf16, #tpu.memory_space<vmem>>, vector<1x8x128xbf16>
    %58 = vector.shape_cast %57 : vector<1x8x128xbf16> to vector<8x128xbf16>
    %59 = arith.extf %58 : vector<8x128xbf16> to vector<8x128xf32>
    %c32 = arith.constant 32 : index
    %c0_17 = arith.constant 0 : index
    %60 = vector.load %arg8[%c32, %c0_17] : memref<72x128xf32, #tpu.memory_space<vmem>>, vector<8x128xf32>
    tpu.vector_store %arg8[%c32, %c0_17], %59 {strides = array<i32>} : memref<72x128xf32, #tpu.memory_space<vmem>>, vector<8x128xf32>,
    %61 = arith.index_cast %arg1 : i32 to index
    %c0_18 = arith.constant 0 : index
    %c129 = arith.constant 129 : index
    %62 = vector.load %arg7[%61, %c0_18, %c129] : memref<2x8x384xbf16, #tpu.memory_space<vmem>>, vector<1x8x128xbf16>
    %63 = vector.shape_cast %62 : vector<1x8x128xbf16> to vector<8x128xbf16>
    %cst_19 = arith.constant 0.000000e+00 : bf16
    %64 = vector.broadcast %cst_19 : bf16 to vector<8x128xbf16>
    %65 = vector.shape_cast %23 : vector<1x128xi1> to vector<1x128xi1>
    %66 = vector.broadcast %65 : vector<1x128xi1> to vector<8x128xi1>
    %67 = arith.select %66, %63, %64 : vector<8x128xi1>, vector<8x128xbf16>
    %68 = arith.extf %67 : vector<8x128xbf16> to vector<8x128xf32>
    %c40 = arith.constant 40 : index
    %c0_20 = arith.constant 0 : index
    %69 = vector.load %arg8[%c40, %c0_20] : memref<72x128xf32, #tpu.memory_space<vmem>>, vector<8x128xf32>
    tpu.vector_store %arg8[%c40, %c0_20], %68 {strides = array<i32>} : memref<72x128xf32, #tpu.memory_space<vmem>>, vector<8x128xf32>,
    %70 = arith.index_cast %arg1 : i32 to index
    %c0_21 = arith.constant 0 : index
    %c143 = arith.constant 143 : index
    %71 = vector.load %arg7[%70, %c0_21, %c143] : memref<2x8x384xbf16, #tpu.memory_space<vmem>>, vector<1x8x128xbf16>
    %72 = vector.shape_cast %71 : vector<1x8x128xbf16> to vector<8x128xbf16>
    %cst_22 = arith.constant 0.000000e+00 : bf16
    %73 = vector.broadcast %cst_22 : bf16 to vector<8x128xbf16>
    %74 = vector.shape_cast %21 : vector<1x128xi1> to vector<1x128xi1>
    %75 = vector.broadcast %74 : vector<1x128xi1> to vector<8x128xi1>
    %76 = arith.select %75, %72, %73 : vector<8x128xi1>, vector<8x128xbf16>
    %77 = arith.extf %76 : vector<8x128xbf16> to vector<8x128xf32>
    %c48 = arith.constant 48 : index
    %c0_23 = arith.constant 0 : index
    %78 = vector.load %arg8[%c48, %c0_23] : memref<72x128xf32, #tpu.memory_space<vmem>>, vector<8x128xf32>
    tpu.vector_store %arg8[%c48, %c0_23], %77 {strides = array<i32>} : memref<72x128xf32, #tpu.memory_space<vmem>>, vector<8x128xf32>,
    %79 = arith.index_cast %arg1 : i32 to index
    %c0_24 = arith.constant 0 : index
    %c144 = arith.constant 144 : index
    %80 = vector.load %arg7[%79, %c0_24, %c144] : memref<2x8x384xbf16, #tpu.memory_space<vmem>>, vector<1x8x128xbf16>
    %81 = vector.shape_cast %80 : vector<1x8x128xbf16> to vector<8x128xbf16>
    %82 = arith.extf %81 : vector<8x128xbf16> to vector<8x128xf32>
    %c56 = arith.constant 56 : index
    %c0_25 = arith.constant 0 : index
    %83 = vector.load %arg8[%c56, %c0_25] : memref<72x128xf32, #tpu.memory_space<vmem>>, vector<8x128xf32>
    tpu.vector_store %arg8[%c56, %c0_25], %82 {strides = array<i32>} : memref<72x128xf32, #tpu.memory_space<vmem>>, vector<8x128xf32>,
    %84 = arith.index_cast %arg1 : i32 to index
    %c0_26 = arith.constant 0 : index
    %c145 = arith.constant 145 : index
    %85 = vector.load %arg7[%84, %c0_26, %c145] : memref<2x8x384xbf16, #tpu.memory_space<vmem>>, vector<1x8x128xbf16>
    %86 = vector.shape_cast %85 : vector<1x8x128xbf16> to vector<8x128xbf16>
    %cst_27 = arith.constant 0.000000e+00 : bf16
    %87 = vector.broadcast %cst_27 : bf16 to vector<8x128xbf16>
    %88 = vector.shape_cast %23 : vector<1x128xi1> to vector<1x128xi1>
    %89 = vector.broadcast %88 : vector<1x128xi1> to vector<8x128xi1>
    %90 = arith.select %89, %86, %87 : vector<8x128xi1>, vector<8x128xbf16>
    %91 = arith.extf %90 : vector<8x128xbf16> to vector<8x128xf32>
    %c64 = arith.constant 64 : index
    %c0_28 = arith.constant 0 : index
    %92 = vector.load %arg8[%c64, %c0_28] : memref<72x128xf32, #tpu.memory_space<vmem>>, vector<8x128xf32>
    tpu.vector_store %arg8[%c64, %c0_28], %91 {strides = array<i32>} : memref<72x128xf32, #tpu.memory_space<vmem>>, vector<8x128xf32>,
    %c0_29 = arith.constant 0 : index
    %c0_30 = arith.constant 0 : index
    %93 = vector.load %arg3[%c0_29, %c0_30] : memref<8x72xbf16, #tpu.memory_space<vmem>>, vector<8x72xbf16>
    %c0_31 = arith.constant 0 : index
    %c0_32 = arith.constant 0 : index
    %94 = vector.load %arg8[%c0_31, %c0_32] : memref<72x128xf32, #tpu.memory_space<vmem>>, vector<72x128xf32>
    %95 = arith.truncf %94 : vector<72x128xf32> to vector<72x128xbf16>
    %cst_33 = arith.constant dense<0.000000e+00> : vector<8x128xf32>
    %96 = tpu.matmul %93, %95, %cst_33 {dimension_numbers = #tpu.dot_dimension_numbers<[1], [0], [0], [1], [0, 0, 1, 1], [], []>} : vector<8x72xbf16>, vector<72x128xbf16>, vector<8x128xf32> -> vector<8x128xf32>
    %c0_34 = arith.constant 0 : index
    %c0_35 = arith.constant 0 : index
    %97 = vector.load %arg4[%c0_34, %c0_35] : memref<8x1xf32, #tpu.memory_space<vmem>>, vector<8x1xf32>
    %98 = vector.broadcast %97 : vector<8x1xf32> to vector<8x128xf32>
    %99 = arith.addf %96, %98 : vector<8x128xf32>
    %100 = arith.truncf %99 : vector<8x128xf32> to vector<8x128xbf16>
    %101 = vector.shape_cast %100 : vector<8x128xbf16> to vector<1x8x128xbf16>
    %c0_36 = arith.constant 0 : index
    %c0_37 = arith.constant 0 : index
    %c0_38 = arith.constant 0 : index
    %102 = vector.load %arg5[%c0_36, %c0_37, %c0_38] : memref<1x8x128xbf16, #tpu.memory_space<vmem>>, vector<1x8x128xbf16>
    tpu.vector_store %arg5[%c0_36, %c0_37, %c0_38], %101 {strides = array<i32>} : memref<1x8x128xbf16, #tpu.memory_space<vmem>>, vector<1x8x128xbf16>,
    %cst_39 = arith.constant dense<0.000000e+00> : vector<8xf32>
    %103 = vector.multi_reduction <add>, %99, %cst_39 [1] : vector<8x128xf32> to vector<8xf32>
    %104 = vector.shape_cast %103 : vector<8xf32> to vector<8x1xf32>
    %105 = arith.mulf %99, %99 : vector<8x128xf32>
    %cst_40 = arith.constant dense<0.000000e+00> : vector<8xf32>
    %106 = vector.multi_reduction <add>, %105, %cst_40 [1] : vector<8x128xf32> to vector<8xf32>
    %107 = vector.shape_cast %106 : vector<8xf32> to vector<8x1xf32>
    %108 = tpu.concatenate %104, %107 in 1 : vector<8x1xf32>, vector<8x1xf32> -> vector<8x2xf32>
    %109 = vector.shape_cast %108 : vector<8x2xf32> to vector<1x1x8x2xf32>
    %c0_41 = arith.constant 0 : index
    %c0_42 = arith.constant 0 : index
    %c0_43 = arith.constant 0 : index
    %c0_44 = arith.constant 0 : index
    %110 = vector.load %arg6[%c0_41, %c0_42, %c0_43, %c0_44] : memref<1x1x8x2xf32, #tpu.memory_space<vmem>>, vector<1x1x8x2xf32>
    tpu.vector_store %arg6[%c0_41, %c0_42, %c0_43, %c0_44], %109 {strides = array<i32>} : memref<1x1x8x2xf32, #tpu.memory_space<vmem>>, vector<1x1x8x2xf32>,
    return
  }
  func.func @transform_0(%arg0: i32, %arg1: i32) -> (i32, i32, i32) {
    %c0_i32 = arith.constant 0 : i32
    %c0_i32_0 = arith.constant 0 : i32
    %c0_i32_1 = arith.constant 0 : i32
    return %arg0, %c0_i32, %c0_i32_0 : i32, i32, i32
  }
  func.func @transform_1(%arg0: i32, %arg1: i32) -> (i32, i32) {
    %c0_i32 = arith.constant 0 : i32
    %c0_i32_0 = arith.constant 0 : i32
    %c0_i32_1 = arith.constant 0 : i32
    return %c0_i32, %c0_i32_0 : i32, i32
  }
  func.func @transform_2(%arg0: i32, %arg1: i32) -> (i32, i32) {
    %c0_i32 = arith.constant 0 : i32
    %c0_i32_0 = arith.constant 0 : i32
    %c0_i32_1 = arith.constant 0 : i32
    return %c0_i32, %c0_i32_0 : i32, i32
  }
  func.func @transform_3(%arg0: i32, %arg1: i32) -> (i32, i32, i32) {
    %c0_i32 = arith.constant 0 : i32
    %c0_i32_0 = arith.constant 0 : i32
    return %arg0, %c0_i32, %arg1 : i32, i32, i32
  }
  func.func @transform_4(%arg0: i32, %arg1: i32) -> (i32, i32, i32, i32) {
    %c0_i32 = arith.constant 0 : i32
    %c0_i32_0 = arith.constant 0 : i32
    %c0_i32_1 = arith.constant 0 : i32
    return %arg0, %arg1, %c0_i32, %c0_i32_0 : i32, i32, i32, i32
  }
}

module attributes {stable_mosaic.version = 11 : i64} {
  func.func @_conv3x3_kernel(%arg0: i32, %arg1: i32, %arg2: memref<1x8x256xf32, #tpu.memory_space<vmem>>, %arg3: memref<1x8x256xbf16, #tpu.memory_space<vmem>>, %arg4: memref<8x1xf32, #tpu.memory_space<vmem>>, %arg5: memref<8x1xf32, #tpu.memory_space<vmem>>, %arg6: memref<8x72xbf16, #tpu.memory_space<vmem>>, %arg7: memref<8x1xf32, #tpu.memory_space<vmem>>, %arg8: memref<1x8x128xbf16, #tpu.memory_space<vmem>>, %arg9: memref<1x1x8x2xf32, #tpu.memory_space<vmem>>, %arg10: memref<2x8x384xbf16, #tpu.memory_space<vmem>>, %arg11: memref<72x128xf32, #tpu.memory_space<vmem>>) attributes {dimension_semantics = [#tpu.dimension_semantics<parallel>, #tpu.dimension_semantics<arbitrary>], iteration_bounds = array<i64: 2, 2>, scalar_prefetch = 0 : i64, scratch_operands = 2 : i64, tpu.core_type = #tpu.core_type<tc>, window_params = [{transform_indices = @transform_0, window_bounds = array<i64: 1, 8, 256>}, {transform_indices = @transform_1, window_bounds = array<i64: 1, 8, 256>}, {pipeline_mode = #tpu.pipeline_mode<synchronous>, transform_indices = @transform_2, window_bounds = array<i64: 8, 1>}, {pipeline_mode = #tpu.pipeline_mode<synchronous>, transform_indices = @transform_3, window_bounds = array<i64: 8, 1>}, {pipeline_mode = #tpu.pipeline_mode<synchronous>, transform_indices = @transform_4, window_bounds = array<i64: 8, 72>}, {pipeline_mode = #tpu.pipeline_mode<synchronous>, transform_indices = @transform_5, window_bounds = array<i64: 8, 1>}, {transform_indices = @transform_6, window_bounds = array<i64: 1, 8, 128>}, {transform_indices = @transform_7, window_bounds = array<i64: 1, 1, 8, 2>}]} {
    %c0_i32 = arith.constant 0 : i32
    %0 = arith.cmpi eq, %arg1, %c0_i32 : i32
    %1 = arith.extui %0 : i1 to i32
    %c0_i32_0 = arith.constant 0 : i32
    %2 = arith.cmpi ne, %1, %c0_i32_0 : i32
    scf.if %2 {
      %c0_45 = arith.constant 0 : index
      %c0_46 = arith.constant 0 : index
      %c0_47 = arith.constant 0 : index
      %111 = vector.load %arg2[%c0_45, %c0_46, %c0_47] : memref<1x8x256xf32, #tpu.memory_space<vmem>>, vector<1x8x256xf32>
      %112 = vector.shape_cast %111 : vector<1x8x256xf32> to vector<8x256xf32>
      %c0_48 = arith.constant 0 : index
      %c0_49 = arith.constant 0 : index
      %c0_50 = arith.constant 0 : index
      %113 = vector.load %arg3[%c0_48, %c0_49, %c0_50] : memref<1x8x256xbf16, #tpu.memory_space<vmem>>, vector<1x8x256xbf16>
      %114 = vector.shape_cast %113 : vector<1x8x256xbf16> to vector<8x256xbf16>
      %115 = arith.extf %114 : vector<8x256xbf16> to vector<8x256xf32>
      %c0_51 = arith.constant 0 : index
      %c0_52 = arith.constant 0 : index
      %116 = vector.load %arg4[%c0_51, %c0_52] : memref<8x1xf32, #tpu.memory_space<vmem>>, vector<8x1xf32>
      %117 = vector.broadcast %116 : vector<8x1xf32> to vector<8x256xf32>
      %118 = arith.mulf %115, %117 : vector<8x256xf32>
      %c0_53 = arith.constant 0 : index
      %c0_54 = arith.constant 0 : index
      %119 = vector.load %arg5[%c0_53, %c0_54] : memref<8x1xf32, #tpu.memory_space<vmem>>, vector<8x1xf32>
      %120 = vector.broadcast %119 : vector<8x1xf32> to vector<8x256xf32>
      %121 = arith.addf %118, %120 : vector<8x256xf32>
      %cst_55 = arith.constant 0.000000e+00 : f32
      %122 = vector.broadcast %cst_55 : f32 to vector<8x256xf32>
      %123 = arith.maximumf %121, %122 : vector<8x256xf32>
      %124 = arith.addf %112, %123 : vector<8x256xf32>
      %125 = arith.truncf %124 : vector<8x256xf32> to vector<8x256xbf16>
      %cst_56 = arith.constant 0.000000e+00 : bf16
      %126 = vector.broadcast %cst_56 : bf16 to vector<8x128xbf16>
      %127 = tpu.concatenate %126, %125 in 1 : vector<8x128xbf16>, vector<8x256xbf16> -> vector<8x384xbf16>
      %c0_57 = arith.constant 0 : index
      %c0_58 = arith.constant 0 : index
      %c0_59 = arith.constant 0 : index
      %128 = vector.load %arg10[%c0_57, %c0_58, %c0_59] : memref<2x8x384xbf16, #tpu.memory_space<vmem>>, vector<1x8x384xbf16>
      %129 = vector.shape_cast %128 : vector<1x8x384xbf16> to vector<8x384xbf16>
      %130 = vector.shape_cast %127 : vector<8x384xbf16> to vector<1x8x384xbf16>
      tpu.vector_store %arg10[%c0_57, %c0_58, %c0_59], %130 {strides = array<i32>} : memref<2x8x384xbf16, #tpu.memory_space<vmem>>, vector<1x8x384xbf16>,
      %cst_60 = arith.constant 0.000000e+00 : bf16
      %131 = vector.broadcast %cst_60 : bf16 to vector<8x128xbf16>
      %132 = tpu.concatenate %125, %131 in 1 : vector<8x256xbf16>, vector<8x128xbf16> -> vector<8x384xbf16>
      %c1 = arith.constant 1 : index
      %c0_61 = arith.constant 0 : index
      %c0_62 = arith.constant 0 : index
      %133 = vector.load %arg10[%c1, %c0_61, %c0_62] : memref<2x8x384xbf16, #tpu.memory_space<vmem>>, vector<1x8x384xbf16>
      %134 = vector.shape_cast %133 : vector<1x8x384xbf16> to vector<8x384xbf16>
      %135 = vector.shape_cast %132 : vector<8x384xbf16> to vector<1x8x384xbf16>
      tpu.vector_store %arg10[%c1, %c0_61, %c0_62], %135 {strides = array<i32>} : memref<2x8x384xbf16, #tpu.memory_space<vmem>>, vector<1x8x384xbf16>,
    } else {
    }
    %3 = tpu.iota {dimensions = array<i32: 1>} : vector<1x128xi32>
    %c16_i32 = arith.constant 16 : i32
    %c0_i32_1 = arith.constant 0 : i32
    %4 = arith.cmpi eq, %c16_i32, %c0_i32_1 : i32
    %c1_i32 = arith.constant 1 : i32
    %5 = arith.select %4, %c1_i32, %c16_i32 : i32
    %6 = vector.broadcast %5 : i32 to vector<1x128xi32>
    %7 = arith.remsi %3, %6 : vector<1x128xi32>
    %c0_i32_2 = arith.constant 0 : i32
    %8 = vector.broadcast %c0_i32_2 : i32 to vector<1x128xi32>
    %9 = arith.cmpi ne, %7, %8 : vector<1x128xi32>
    %c0_i32_3 = arith.constant 0 : i32
    %10 = vector.broadcast %c0_i32_3 : i32 to vector<1x128xi32>
    %11 = arith.cmpi slt, %7, %10 : vector<1x128xi32>
    %c0_i32_4 = arith.constant 0 : i32
    %12 = arith.cmpi slt, %5, %c0_i32_4 : i32
    %13 = vector.broadcast %12 : i1 to vector<1x128xi1>
    %14 = vector.broadcast %13 : vector<1x128xi1> to vector<1x128xi1>
    %15 = arith.xori %11, %14 : vector<1x128xi1>
    %16 = arith.andi %15, %9 : vector<1x128xi1>
    %17 = vector.broadcast %5 : i32 to vector<1x128xi32>
    %18 = arith.addi %7, %17 : vector<1x128xi32>
    %19 = arith.select %16, %18, %7 : vector<1x128xi1>, vector<1x128xi32>
    %c0_i32_5 = arith.constant 0 : i32
    %20 = vector.broadcast %c0_i32_5 : i32 to vector<1x128xi32>
    %21 = arith.cmpi sgt, %19, %20 : vector<1x128xi32>
    %c15_i32 = arith.constant 15 : i32
    %22 = vector.broadcast %c15_i32 : i32 to vector<1x128xi32>
    %23 = arith.cmpi slt, %19, %22 : vector<1x128xi32>
    %24 = arith.index_cast %arg1 : i32 to index
    %c0 = arith.constant 0 : index
    %c111 = arith.constant 111 : index
    %25 = vector.load %arg10[%24, %c0, %c111] : memref<2x8x384xbf16, #tpu.memory_space<vmem>>, vector<1x8x128xbf16>
    %26 = vector.shape_cast %25 : vector<1x8x128xbf16> to vector<8x128xbf16>
    %cst = arith.constant 0.000000e+00 : bf16
    %27 = vector.broadcast %cst : bf16 to vector<8x128xbf16>
    %28 = vector.shape_cast %21 : vector<1x128xi1> to vector<1x128xi1>
    %29 = vector.broadcast %28 : vector<1x128xi1> to vector<8x128xi1>
    %30 = arith.select %29, %26, %27 : vector<8x128xi1>, vector<8x128xbf16>
    %31 = arith.extf %30 : vector<8x128xbf16> to vector<8x128xf32>
    %c0_6 = arith.constant 0 : index
    %c0_7 = arith.constant 0 : index
    %32 = vector.load %arg11[%c0_6, %c0_7] : memref<72x128xf32, #tpu.memory_space<vmem>>, vector<8x128xf32>
    tpu.vector_store %arg11[%c0_6, %c0_7], %31 {strides = array<i32>} : memref<72x128xf32, #tpu.memory_space<vmem>>, vector<8x128xf32>,
    %33 = arith.index_cast %arg1 : i32 to index
    %c0_8 = arith.constant 0 : index
    %c112 = arith.constant 112 : index
    %34 = vector.load %arg10[%33, %c0_8, %c112] : memref<2x8x384xbf16, #tpu.memory_space<vmem>>, vector<1x8x128xbf16>
    %35 = vector.shape_cast %34 : vector<1x8x128xbf16> to vector<8x128xbf16>
    %36 = arith.extf %35 : vector<8x128xbf16> to vector<8x128xf32>
    %c8 = arith.constant 8 : index
    %c0_9 = arith.constant 0 : index
    %37 = vector.load %arg11[%c8, %c0_9] : memref<72x128xf32, #tpu.memory_space<vmem>>, vector<8x128xf32>
    tpu.vector_store %arg11[%c8, %c0_9], %36 {strides = array<i32>} : memref<72x128xf32, #tpu.memory_space<vmem>>, vector<8x128xf32>,
    %38 = arith.index_cast %arg1 : i32 to index
    %c0_10 = arith.constant 0 : index
    %c113 = arith.constant 113 : index
    %39 = vector.load %arg10[%38, %c0_10, %c113] : memref<2x8x384xbf16, #tpu.memory_space<vmem>>, vector<1x8x128xbf16>
    %40 = vector.shape_cast %39 : vector<1x8x128xbf16> to vector<8x128xbf16>
    %cst_11 = arith.constant 0.000000e+00 : bf16
    %41 = vector.broadcast %cst_11 : bf16 to vector<8x128xbf16>
    %42 = vector.shape_cast %23 : vector<1x128xi1> to vector<1x128xi1>
    %43 = vector.broadcast %42 : vector<1x128xi1> to vector<8x128xi1>
    %44 = arith.select %43, %40, %41 : vector<8x128xi1>, vector<8x128xbf16>
    %45 = arith.extf %44 : vector<8x128xbf16> to vector<8x128xf32>
    %c16 = arith.constant 16 : index
    %c0_12 = arith.constant 0 : index
    %46 = vector.load %arg11[%c16, %c0_12] : memref<72x128xf32, #tpu.memory_space<vmem>>, vector<8x128xf32>
    tpu.vector_store %arg11[%c16, %c0_12], %45 {strides = array<i32>} : memref<72x128xf32, #tpu.memory_space<vmem>>, vector<8x128xf32>,
    %47 = arith.index_cast %arg1 : i32 to index
    %c0_13 = arith.constant 0 : index
    %c127 = arith.constant 127 : index
    %48 = vector.load %arg10[%47, %c0_13, %c127] : memref<2x8x384xbf16, #tpu.memory_space<vmem>>, vector<1x8x128xbf16>
    %49 = vector.shape_cast %48 : vector<1x8x128xbf16> to vector<8x128xbf16>
    %cst_14 = arith.constant 0.000000e+00 : bf16
    %50 = vector.broadcast %cst_14 : bf16 to vector<8x128xbf16>
    %51 = vector.shape_cast %21 : vector<1x128xi1> to vector<1x128xi1>
    %52 = vector.broadcast %51 : vector<1x128xi1> to vector<8x128xi1>
    %53 = arith.select %52, %49, %50 : vector<8x128xi1>, vector<8x128xbf16>
    %54 = arith.extf %53 : vector<8x128xbf16> to vector<8x128xf32>
    %c24 = arith.constant 24 : index
    %c0_15 = arith.constant 0 : index
    %55 = vector.load %arg11[%c24, %c0_15] : memref<72x128xf32, #tpu.memory_space<vmem>>, vector<8x128xf32>
    tpu.vector_store %arg11[%c24, %c0_15], %54 {strides = array<i32>} : memref<72x128xf32, #tpu.memory_space<vmem>>, vector<8x128xf32>,
    %56 = arith.index_cast %arg1 : i32 to index
    %c0_16 = arith.constant 0 : index
    %c128 = arith.constant 128 : index
    %57 = vector.load %arg10[%56, %c0_16, %c128] : memref<2x8x384xbf16, #tpu.memory_space<vmem>>, vector<1x8x128xbf16>
    %58 = vector.shape_cast %57 : vector<1x8x128xbf16> to vector<8x128xbf16>
    %59 = arith.extf %58 : vector<8x128xbf16> to vector<8x128xf32>
    %c32 = arith.constant 32 : index
    %c0_17 = arith.constant 0 : index
    %60 = vector.load %arg11[%c32, %c0_17] : memref<72x128xf32, #tpu.memory_space<vmem>>, vector<8x128xf32>
    tpu.vector_store %arg11[%c32, %c0_17], %59 {strides = array<i32>} : memref<72x128xf32, #tpu.memory_space<vmem>>, vector<8x128xf32>,
    %61 = arith.index_cast %arg1 : i32 to index
    %c0_18 = arith.constant 0 : index
    %c129 = arith.constant 129 : index
    %62 = vector.load %arg10[%61, %c0_18, %c129] : memref<2x8x384xbf16, #tpu.memory_space<vmem>>, vector<1x8x128xbf16>
    %63 = vector.shape_cast %62 : vector<1x8x128xbf16> to vector<8x128xbf16>
    %cst_19 = arith.constant 0.000000e+00 : bf16
    %64 = vector.broadcast %cst_19 : bf16 to vector<8x128xbf16>
    %65 = vector.shape_cast %23 : vector<1x128xi1> to vector<1x128xi1>
    %66 = vector.broadcast %65 : vector<1x128xi1> to vector<8x128xi1>
    %67 = arith.select %66, %63, %64 : vector<8x128xi1>, vector<8x128xbf16>
    %68 = arith.extf %67 : vector<8x128xbf16> to vector<8x128xf32>
    %c40 = arith.constant 40 : index
    %c0_20 = arith.constant 0 : index
    %69 = vector.load %arg11[%c40, %c0_20] : memref<72x128xf32, #tpu.memory_space<vmem>>, vector<8x128xf32>
    tpu.vector_store %arg11[%c40, %c0_20], %68 {strides = array<i32>} : memref<72x128xf32, #tpu.memory_space<vmem>>, vector<8x128xf32>,
    %70 = arith.index_cast %arg1 : i32 to index
    %c0_21 = arith.constant 0 : index
    %c143 = arith.constant 143 : index
    %71 = vector.load %arg10[%70, %c0_21, %c143] : memref<2x8x384xbf16, #tpu.memory_space<vmem>>, vector<1x8x128xbf16>
    %72 = vector.shape_cast %71 : vector<1x8x128xbf16> to vector<8x128xbf16>
    %cst_22 = arith.constant 0.000000e+00 : bf16
    %73 = vector.broadcast %cst_22 : bf16 to vector<8x128xbf16>
    %74 = vector.shape_cast %21 : vector<1x128xi1> to vector<1x128xi1>
    %75 = vector.broadcast %74 : vector<1x128xi1> to vector<8x128xi1>
    %76 = arith.select %75, %72, %73 : vector<8x128xi1>, vector<8x128xbf16>
    %77 = arith.extf %76 : vector<8x128xbf16> to vector<8x128xf32>
    %c48 = arith.constant 48 : index
    %c0_23 = arith.constant 0 : index
    %78 = vector.load %arg11[%c48, %c0_23] : memref<72x128xf32, #tpu.memory_space<vmem>>, vector<8x128xf32>
    tpu.vector_store %arg11[%c48, %c0_23], %77 {strides = array<i32>} : memref<72x128xf32, #tpu.memory_space<vmem>>, vector<8x128xf32>,
    %79 = arith.index_cast %arg1 : i32 to index
    %c0_24 = arith.constant 0 : index
    %c144 = arith.constant 144 : index
    %80 = vector.load %arg10[%79, %c0_24, %c144] : memref<2x8x384xbf16, #tpu.memory_space<vmem>>, vector<1x8x128xbf16>
    %81 = vector.shape_cast %80 : vector<1x8x128xbf16> to vector<8x128xbf16>
    %82 = arith.extf %81 : vector<8x128xbf16> to vector<8x128xf32>
    %c56 = arith.constant 56 : index
    %c0_25 = arith.constant 0 : index
    %83 = vector.load %arg11[%c56, %c0_25] : memref<72x128xf32, #tpu.memory_space<vmem>>, vector<8x128xf32>
    tpu.vector_store %arg11[%c56, %c0_25], %82 {strides = array<i32>} : memref<72x128xf32, #tpu.memory_space<vmem>>, vector<8x128xf32>,
    %84 = arith.index_cast %arg1 : i32 to index
    %c0_26 = arith.constant 0 : index
    %c145 = arith.constant 145 : index
    %85 = vector.load %arg10[%84, %c0_26, %c145] : memref<2x8x384xbf16, #tpu.memory_space<vmem>>, vector<1x8x128xbf16>
    %86 = vector.shape_cast %85 : vector<1x8x128xbf16> to vector<8x128xbf16>
    %cst_27 = arith.constant 0.000000e+00 : bf16
    %87 = vector.broadcast %cst_27 : bf16 to vector<8x128xbf16>
    %88 = vector.shape_cast %23 : vector<1x128xi1> to vector<1x128xi1>
    %89 = vector.broadcast %88 : vector<1x128xi1> to vector<8x128xi1>
    %90 = arith.select %89, %86, %87 : vector<8x128xi1>, vector<8x128xbf16>
    %91 = arith.extf %90 : vector<8x128xbf16> to vector<8x128xf32>
    %c64 = arith.constant 64 : index
    %c0_28 = arith.constant 0 : index
    %92 = vector.load %arg11[%c64, %c0_28] : memref<72x128xf32, #tpu.memory_space<vmem>>, vector<8x128xf32>
    tpu.vector_store %arg11[%c64, %c0_28], %91 {strides = array<i32>} : memref<72x128xf32, #tpu.memory_space<vmem>>, vector<8x128xf32>,
    %c0_29 = arith.constant 0 : index
    %c0_30 = arith.constant 0 : index
    %93 = vector.load %arg6[%c0_29, %c0_30] : memref<8x72xbf16, #tpu.memory_space<vmem>>, vector<8x72xbf16>
    %c0_31 = arith.constant 0 : index
    %c0_32 = arith.constant 0 : index
    %94 = vector.load %arg11[%c0_31, %c0_32] : memref<72x128xf32, #tpu.memory_space<vmem>>, vector<72x128xf32>
    %95 = arith.truncf %94 : vector<72x128xf32> to vector<72x128xbf16>
    %cst_33 = arith.constant dense<0.000000e+00> : vector<8x128xf32>
    %96 = tpu.matmul %93, %95, %cst_33 {dimension_numbers = #tpu.dot_dimension_numbers<[1], [0], [0], [1], [0, 0, 1, 1], [], []>} : vector<8x72xbf16>, vector<72x128xbf16>, vector<8x128xf32> -> vector<8x128xf32>
    %c0_34 = arith.constant 0 : index
    %c0_35 = arith.constant 0 : index
    %97 = vector.load %arg7[%c0_34, %c0_35] : memref<8x1xf32, #tpu.memory_space<vmem>>, vector<8x1xf32>
    %98 = vector.broadcast %97 : vector<8x1xf32> to vector<8x128xf32>
    %99 = arith.addf %96, %98 : vector<8x128xf32>
    %100 = arith.truncf %99 : vector<8x128xf32> to vector<8x128xbf16>
    %101 = vector.shape_cast %100 : vector<8x128xbf16> to vector<1x8x128xbf16>
    %c0_36 = arith.constant 0 : index
    %c0_37 = arith.constant 0 : index
    %c0_38 = arith.constant 0 : index
    %102 = vector.load %arg8[%c0_36, %c0_37, %c0_38] : memref<1x8x128xbf16, #tpu.memory_space<vmem>>, vector<1x8x128xbf16>
    tpu.vector_store %arg8[%c0_36, %c0_37, %c0_38], %101 {strides = array<i32>} : memref<1x8x128xbf16, #tpu.memory_space<vmem>>, vector<1x8x128xbf16>,
    %cst_39 = arith.constant dense<0.000000e+00> : vector<8xf32>
    %103 = vector.multi_reduction <add>, %99, %cst_39 [1] : vector<8x128xf32> to vector<8xf32>
    %104 = vector.shape_cast %103 : vector<8xf32> to vector<8x1xf32>
    %105 = arith.mulf %99, %99 : vector<8x128xf32>
    %cst_40 = arith.constant dense<0.000000e+00> : vector<8xf32>
    %106 = vector.multi_reduction <add>, %105, %cst_40 [1] : vector<8x128xf32> to vector<8xf32>
    %107 = vector.shape_cast %106 : vector<8xf32> to vector<8x1xf32>
    %108 = tpu.concatenate %104, %107 in 1 : vector<8x1xf32>, vector<8x1xf32> -> vector<8x2xf32>
    %109 = vector.shape_cast %108 : vector<8x2xf32> to vector<1x1x8x2xf32>
    %c0_41 = arith.constant 0 : index
    %c0_42 = arith.constant 0 : index
    %c0_43 = arith.constant 0 : index
    %c0_44 = arith.constant 0 : index
    %110 = vector.load %arg9[%c0_41, %c0_42, %c0_43, %c0_44] : memref<1x1x8x2xf32, #tpu.memory_space<vmem>>, vector<1x1x8x2xf32>
    tpu.vector_store %arg9[%c0_41, %c0_42, %c0_43, %c0_44], %109 {strides = array<i32>} : memref<1x1x8x2xf32, #tpu.memory_space<vmem>>, vector<1x1x8x2xf32>,
    return
  }
  func.func @transform_0(%arg0: i32, %arg1: i32) -> (i32, i32, i32) {
    %c0_i32 = arith.constant 0 : i32
    %c0_i32_0 = arith.constant 0 : i32
    %c0_i32_1 = arith.constant 0 : i32
    return %arg0, %c0_i32, %c0_i32_0 : i32, i32, i32
  }
  func.func @transform_1(%arg0: i32, %arg1: i32) -> (i32, i32, i32) {
    %c0_i32 = arith.constant 0 : i32
    %c0_i32_0 = arith.constant 0 : i32
    %c0_i32_1 = arith.constant 0 : i32
    return %arg0, %c0_i32, %c0_i32_0 : i32, i32, i32
  }
  func.func @transform_2(%arg0: i32, %arg1: i32) -> (i32, i32) {
    %c0_i32 = arith.constant 0 : i32
    %c0_i32_0 = arith.constant 0 : i32
    %c0_i32_1 = arith.constant 0 : i32
    return %c0_i32, %c0_i32_0 : i32, i32
  }
  func.func @transform_3(%arg0: i32, %arg1: i32) -> (i32, i32) {
    %c0_i32 = arith.constant 0 : i32
    %c0_i32_0 = arith.constant 0 : i32
    %c0_i32_1 = arith.constant 0 : i32
    return %c0_i32, %c0_i32_0 : i32, i32
  }
  func.func @transform_4(%arg0: i32, %arg1: i32) -> (i32, i32) {
    %c0_i32 = arith.constant 0 : i32
    %c0_i32_0 = arith.constant 0 : i32
    %c0_i32_1 = arith.constant 0 : i32
    return %c0_i32, %c0_i32_0 : i32, i32
  }
  func.func @transform_5(%arg0: i32, %arg1: i32) -> (i32, i32) {
    %c0_i32 = arith.constant 0 : i32
    %c0_i32_0 = arith.constant 0 : i32
    %c0_i32_1 = arith.constant 0 : i32
    return %c0_i32, %c0_i32_0 : i32, i32
  }
  func.func @transform_6(%arg0: i32, %arg1: i32) -> (i32, i32, i32) {
    %c0_i32 = arith.constant 0 : i32
    %c0_i32_0 = arith.constant 0 : i32
    return %arg0, %c0_i32, %arg1 : i32, i32, i32
  }
  func.func @transform_7(%arg0: i32, %arg1: i32) -> (i32, i32, i32, i32) {
    %c0_i32 = arith.constant 0 : i32
    %c0_i32_0 = arith.constant 0 : i32
    %c0_i32_1 = arith.constant 0 : i32
    return %arg0, %arg1, %c0_i32, %c0_i32_0 : i32, i32, i32, i32
  }
}

module attributes {stable_mosaic.version = 11 : i64} {
  func.func @_bn_relu_kernel(%arg0: i32, %arg1: memref<1x8x256xbf16, #tpu.memory_space<vmem>>, %arg2: memref<8x1xf32, #tpu.memory_space<vmem>>, %arg3: memref<8x1xf32, #tpu.memory_space<vmem>>, %arg4: memref<1x8x256xf32, #tpu.memory_space<vmem>>) attributes {dimension_semantics = [#tpu.dimension_semantics<parallel>], iteration_bounds = array<i64: 2>, scalar_prefetch = 0 : i64, scratch_operands = 0 : i64, tpu.core_type = #tpu.core_type<tc>, window_params = [{transform_indices = @transform_0, window_bounds = array<i64: 1, 8, 256>}, {pipeline_mode = #tpu.pipeline_mode<synchronous>, transform_indices = @transform_1, window_bounds = array<i64: 8, 1>}, {pipeline_mode = #tpu.pipeline_mode<synchronous>, transform_indices = @transform_2, window_bounds = array<i64: 8, 1>}, {transform_indices = @transform_3, window_bounds = array<i64: 1, 8, 256>}]} {
    %c0 = arith.constant 0 : index
    %c0_0 = arith.constant 0 : index
    %c0_1 = arith.constant 0 : index
    %0 = vector.load %arg1[%c0, %c0_0, %c0_1] : memref<1x8x256xbf16, #tpu.memory_space<vmem>>, vector<1x8x256xbf16>
    %1 = vector.shape_cast %0 : vector<1x8x256xbf16> to vector<8x256xbf16>
    %2 = arith.extf %1 : vector<8x256xbf16> to vector<8x256xf32>
    %c0_2 = arith.constant 0 : index
    %c0_3 = arith.constant 0 : index
    %3 = vector.load %arg2[%c0_2, %c0_3] : memref<8x1xf32, #tpu.memory_space<vmem>>, vector<8x1xf32>
    %4 = vector.broadcast %3 : vector<8x1xf32> to vector<8x256xf32>
    %5 = arith.mulf %2, %4 : vector<8x256xf32>
    %c0_4 = arith.constant 0 : index
    %c0_5 = arith.constant 0 : index
    %6 = vector.load %arg3[%c0_4, %c0_5] : memref<8x1xf32, #tpu.memory_space<vmem>>, vector<8x1xf32>
    %7 = vector.broadcast %6 : vector<8x1xf32> to vector<8x256xf32>
    %8 = arith.addf %5, %7 : vector<8x256xf32>
    %cst = arith.constant 0.000000e+00 : f32
    %9 = vector.broadcast %cst : f32 to vector<8x256xf32>
    %10 = arith.maximumf %8, %9 : vector<8x256xf32>
    %11 = vector.shape_cast %10 : vector<8x256xf32> to vector<1x8x256xf32>
    %c0_6 = arith.constant 0 : index
    %c0_7 = arith.constant 0 : index
    %c0_8 = arith.constant 0 : index
    %12 = vector.load %arg4[%c0_6, %c0_7, %c0_8] : memref<1x8x256xf32, #tpu.memory_space<vmem>>, vector<1x8x256xf32>
    tpu.vector_store %arg4[%c0_6, %c0_7, %c0_8], %11 {strides = array<i32>} : memref<1x8x256xf32, #tpu.memory_space<vmem>>, vector<1x8x256xf32>,
    return
  }
  func.func @transform_0(%arg0: i32) -> (i32, i32, i32) {
    %c0_i32 = arith.constant 0 : i32
    %c0_i32_0 = arith.constant 0 : i32
    %c0_i32_1 = arith.constant 0 : i32
    return %arg0, %c0_i32, %c0_i32_0 : i32, i32, i32
  }
  func.func @transform_1(%arg0: i32) -> (i32, i32) {
    %c0_i32 = arith.constant 0 : i32
    %c0_i32_0 = arith.constant 0 : i32
    %c0_i32_1 = arith.constant 0 : i32
    return %c0_i32, %c0_i32_0 : i32, i32
  }
  func.func @transform_2(%arg0: i32) -> (i32, i32) {
    %c0_i32 = arith.constant 0 : i32
    %c0_i32_0 = arith.constant 0 : i32
    %c0_i32_1 = arith.constant 0 : i32
    return %c0_i32, %c0_i32_0 : i32, i32
  }
  func.func @transform_3(%arg0: i32) -> (i32, i32, i32) {
    %c0_i32 = arith.constant 0 : i32
    %c0_i32_0 = arith.constant 0 : i32
    %c0_i32_1 = arith.constant 0 : i32
    return %arg0, %c0_i32, %c0_i32_0 : i32, i32, i32
  }
}

</mosaic_0001>

<bundles_post_ra>
// kernel: _lambda_.7
= control target key start
LH: loop header
LB: loop body
LE: loop exit
PB: predicated region body
PF: predicated region fallthrough
CT: control target
= control target key end

     0   :  { %s301_s12 = smov 0   ;;  %s324_s0 = inlined_call_operand.vmem [shape: bf16[2,8,256], index: 0, kind: input, shape index: {}]   ;;  %s325_s1 = inlined_call_operand.vmem [shape: f32[8,1], index: 1, kind: input, shape index: {}]   ;;  %s326_s2 = inlined_call_operand.vmem [shape: f32[8,1], index: 2, kind: input, shape index: {}]   ;;  %s327_s3 = inlined_call_operand.vmem [shape: f32[2,8,256], index: 3, kind: output, shape index: {}]  }
   0x1 LB: > { %s249_s13 = sadd.s32 4294967295, %s278_s12   ;;  %p253_p0 = scmp.ge.s32.totalorder %s278_s12, 1  ;;  %s278_s12 = sphi %s301_s12, %s13_s12  }
   0x2   : > { %p137_p1 = scmp.lt.s32.totalorder %s278_s12, 3 }
   0x4   : > { %p138_p2 = pnand %p253_p0, %p137_p1 }
   0x5   : > { %v174_v0 = vld [vmem:[%s325_s1] sm:$0xff] (!%p138_p2)  ;;  %v280_v1 = vmov (!%p138_p2), 0   ;;  %p161_p3 = scmp.lt.s32.totalorder (!%p138_p2), %s249_s13, 1 }
   0x6   : > { %141 = sbr.rel (%p138_p2) target bundleno = 144 (0x90), region = 32  ;;  %271 = vset.pattern.permute.xlu0 (!%p138_p2), %v280_v1  ;;  %v182_v2 = vld [vmem:[%s326_s2] sm:$0xff] (!%p138_p2) }
   0x7   : > { %177 = vperm.xlu0 (!%p138_p2), %271, %v174_v0  }
   0xb   : > { %185 = vperm.xlu0 (!%p138_p2), %271, %v182_v2  }
   0xd   : > { %s329_s13 = smov (!%p161_p3, %s249_s13), 1 }
   0xe   : > { %s260_s18 = sshll.u32 %s329_s13, 3  ;;  %s261_s22 = sshll.u32 %s329_s13, 4 }
   0xf   : > { %s165_s21 = scalar_lea.vmem %s324_s0, %s260_s18  ;;  %s170_s25 = scalar_lea.vmem %s327_s3, %s261_s22 }
  0x10   : > { %v171_v3 = vld [vmem:[%s165_s21] sm:$0xff] }
  0x11   : > { %v172_v4 = vunpack.c.l.bf16 %v171_v3  ;;  %v173_v5 = vunpack.c.h.bf16 %v171_v3 }
  0x86   : > { %v178_v6 = vpop.permute.xlu0 %177 }
  0x87   : > { %v180_v7 = vmul.f32 %v178_v6, %v172_v4  ;;  %v181_v8 = vmul.f32 %v178_v6, %v173_v5 }
  0x8a   : > { %v186_v9 = vpop.permute.xlu0 %185 }
  0x8b   : > { %v188_v10 = vadd.f32 %v186_v9, %v180_v7  ;;  %v189_v11 = vadd.f32 %v186_v9, %v181_v8 }
  0x8d   : > { %v190_v12 = vmax.f32 %v188_v10, 0.0  ;;  %v191_v13 = vmax.f32 %v189_v11, 0.0 }
  0x8f   : > { %192 = vst [vmem:[%s170_s25] sm:$0xff] %v190_v12  ;;  %193 = vst [vmem:[%s170_s25 + $0x8] sm:$0xff] %v191_v13 }
  0x90 PF: > { %s13_s12 = sadd.s32 1, %s278_s12  }
  0x91   : > { %p10_p4 = scmp.ge.s32.totalorder %s13_s12, 4  }
  0x93   :  { %12 = sbr.rel (!%p10_p4) target bundleno = 1 (0x1), region = 62 }

// kernel: _lambda_.5
= control target key start
LH: loop header
LB: loop body
LE: loop exit
PB: predicated region body
PF: predicated region fallthrough
CT: control target
= control target key end

     0   :  { %s1022_s24 = smov 0   ;;  %s1024_s25 = smov 0   ;;  %s1139_s0 = inlined_call_operand.vmem [shape: f32[2,8,256], index: 0, kind: input, shape index: {}]   ;;  %s1140_s1 = inlined_call_operand.vmem [shape: bf16[2,8,256], index: 1, kind: input, shape index: {}]   ;;  %s1141_s2 = inlined_call_operand.vmem [shape: f32[8,1], index: 2, kind: input, shape index: {}]   ;;  %s1142_s3 = inlined_call_operand.vmem [shape: f32[8,1], index: 3, kind: input, shape index: {}]   ;;  %s1143_s4 = inlined_call_operand.vmem [shape: bf16[8,72], index: 4, kind: input, shape index: {}]   ;;  %s1144_s5 = inlined_call_operand.vmem [shape: f32[8,1], index: 5, kind: input, shape index: {}]   ;;  %s1145_s6 = inlined_call_operand.vmem [shape: bf16[2,8,256], index: 6, kind: output, shape index: {0}]   ;;  %s1146_s7 = inlined_call_operand.vmem [shape: f32[2,2,8,2], index: 7, kind: output, shape index: {1}]  }
   0x1   :  { %s1026_s26 = smov 0   ;;  %s1028_s27 = smov 0  }
   0x2   :  { %s1030_s28 = smov 0  }
   0x3 LB: > { %1148 = sst [smem:[#allocation4_spill]] %s964_s27  ;;  %s27_s29 = sadd.s32 1, %s960_s26  ;;  %s968_s28 = sphi %s1030_s28, %s18_s28   ;;  %s964_s27 = sphi %s1028_s27, %s1153_s27   ;;  %s960_s26 = sphi %s1026_s26, %s1155_s26   ;;  %s956_s25 = sphi %s1024_s25, %s1151_s25   ;;  %s952_s24 = sphi %s1022_s24, %s1154_s24  }
   0x4   : > { %s30_s30 = sadd.s32 1, %s964_s27  ;;  %p28_p0 = scmp.ge.s32.totalorder %s27_s29, 2 }
   0x5   : > { %p793_p1 = scmp.ge.s32.totalorder %s968_s28, 1  ;;  %p266_p2 = scmp.lt.s32.totalorder %s968_s28, 5 }
   0x6   : > { %s1157_s29 = smov (%p28_p0, %s27_s29), 0  ;;  %s1159_s30 = smov (!%p28_p0, %s30_s30), %s964_s27 }
   0x7   : > { %1149 = sst [smem:[#allocation5_spill]] %s1157_s29  ;;  %p267_p3 = pnand %p793_p1, %p266_p2 }
   0x8   : > { %p32_p4 = scmp.ge.s32.totalorder %s1159_s30, 2  ;;  %p314_p5 = scmp.lt.s32.totalorder (!%p267_p3), %s956_s25, 1 }
   0x9   : > { %270 = sbr.rel (%p267_p3) target bundleno = 794 (0x31a), region = 44  ;;  %p326_p6 = scmp.lt.s32.totalorder (!%p267_p3), %s952_s24, 1 }
   0xa   : > { %s1161_s30 = smov (%p32_p4, %s1159_s30), 0  ;;  %p802_p7 = scmp.ne.s32.totalorder (!%p267_p3), %s952_s24, 0 }
   0xb   : > { %1150 = sst [smem:[#allocation6_spill]] %s1161_s30 }
  0x10   : > { %s1163_s25 = smov (!%p314_p5, %s956_s25), 1  ;;  %v352_v0 = vld [vmem:[%s1141_s2] sm:$0xff] (!%p802_p7)  ;;  %v970_v1 = vmov (!%p802_p7), 0  }
  0x11   : > { %s327_s8 = scalar_select %p326_p6, %s952_s24, 1 }
  0x12   : > { %s811_s9 = sshll.u32 %s1163_s25, 4  ;;  %s812_s10 = sshll.u32 %s1163_s25, 3  ;;  %888 = vset.pattern.permute.xlu0 (!%p802_p7), %v970_v1  ;;  %v806_v2 = vcombine.low (!%p802_p7), %v970_v1, %v970_v1  ;;  %v360_v3 = vld [vmem:[%s1142_s3] sm:$0xff] (!%p802_p7) }
  0x13   : > { %s318_s13 = scalar_lea.vmem %s1139_s0, %s811_s9  ;;  %s323_s16 = scalar_lea.vmem %s1140_s1, %s812_s10  ;;  %355 = vperm.xlu0 (!%p802_p7), %888, %v352_v0  }
  0x14   : > { %s798_s17 = sshll.u32 %s1163_s25, 1  ;;  %346 = sbr.rel (%p802_p7) target bundleno = 162 (0xa2), region = 48  ;;  %392 = vst [vmem:[#allocation2 + $0x14] sm:$0xf] (!%p802_p7), %v806_v2  ;;  %v349_v4 = vld [vmem:[%s323_s16] sm:$0xff] (!%p802_p7)  ;;  %v348_v14 = vld [vmem:[%s318_s13 + $0x8] sm:$0xff] (!%p802_p7) }
  0x15   : > { %s329_s18 = sadd.s32 %s798_s17, %s327_s8  ;;  %v350_v5 = vunpack.c.l.bf16 (!%p802_p7), %v349_v4  ;;  %v351_v6 = vunpack.c.h.bf16 (!%p802_p7), %v349_v4  ;;  %v347_v13 = vld [vmem:[%s318_s13] sm:$0xff] (!%p802_p7) }
  0x16   : > { %s799_s19 = sshll.u32 %s329_s18, 2  ;;  %s801_s20 = sshll.u32 %s329_s18, 3 }
  0x17   : > { %s1065_s23 = scalar_lea.vmem %s1145_s6, %s799_s19  ;;  %s1070_s27 = scalar_lea.vmem %s1146_s7, %s801_s20  ;;  %363 = vperm.xlu0 (!%p802_p7), %888, %v360_v3  }
  0x92   : > { %v356_v7 = vpop.permute.xlu0 %355 }
  0x93   : > { %v358_v8 = vmul.f32 %v356_v7, %v350_v5  ;;  %v359_v9 = vmul.f32 %v356_v7, %v351_v6 }
  0x96   : > { %v364_v10 = vpop.permute.xlu0 %363 }
  0x97   : > { %v366_v11 = vadd.f32 %v364_v10, %v358_v8  ;;  %v367_v12 = vadd.f32 %v364_v10, %v359_v9 }
  0x99   : > { %v368_v15 = vmax.f32 %v366_v11, 0.0  ;;  %v369_v16 = vmax.f32 %v367_v12, 0.0 }
  0x9b   : > { %v370_v17 = vadd.f32 %v368_v15, %v347_v13  ;;  %v371_v18 = vadd.f32 %v369_v16, %v348_v14 }
  0x9d   : > { %v372_v19 = vpack.c.bf16 %v370_v17, %v370_v17  ;;  %v813_v20 = vpack.c.bf16 %v371_v18, %v371_v18  ;;  %v814_v21 = vpack.c.bf16 %v371_v18, %v370_v17 }
  0x9f   : > { %v803_v22 = vcombine.low %v970_v1, %v372_v19  ;;  %385 = vst [vmem:[#allocation2 + $0x8] sm:$0xf] %v813_v20  ;;  %391 = vst [vmem:[#allocation2 + $0xc] sm:$0xff] %v814_v21 }
  0xa1   : > { %384 = vst [vmem:[#allocation2] sm:$0xff] %v803_v22 }
  0xa2 PF: > { %v393_v23 = vlaneseq  ;;  %v971_v24 = vmov 0   ;;  %s815_s29 = smul.u32 12, %s952_s24  ;;  %s972_s30 = smov 111   ;;  %vm420_vm4 = vcmask 908288   ;;  %vm477_vm5 = vcmask 1039360   ;;  %v584_v16 = vld [vmem:[%s1144_s5] sm:$0xff] }
  0xa3   : > { %929 = vset.pattern.permute.xlu0 %v971_v24  ;;  %s973_s10 = smov 127   ;;  %s974_s13 = smov 113   ;;  %v979_v37 = vmov 0.0   ;;  %vm457_vm8 = vcmask 924672   ;;  %vm489_vm9 = vcmask 7168   ;;  %vm469_vm10 = vcmask 121856  }
  0xa4   : > { %v394_v25 = vand.u32 127, %v393_v23  ;;  %s1082_s12 = scalar_lea.vmem [#allocation2], %s815_s29  ;;  %s975_s24 = smov 1   ;;  %822 = vmatprep.subr.bf16.mxu0 %v979_v37  ;;  %vm432_vm11 = vcmask 138240  }
  0xa5   : > { %s976_s14 = smov 15   ;;  %s977_s15 = smov 17  }
  0xa6   : > { %v399_v26 = vand.u32 15, %v394_v25  ;;  %s978_s16 = smov 16   ;;  %s981_s17 = smov 112  }
  0xa8   : > { %vm407_vm0 = vcmp.gt.s32.totalorder %v399_v26, 0  ;;  %vm408_vm1 = vcmp.lt.s32.totalorder %v399_v26, 15  ;;  %v412_v29 = vld [vmem:[%s1082_s12] sm:$0xff] }
  0xa9   : > { %vm415_vm2 = vmpackc.low %vm407_vm0, %vm407_vm0  ;;  %v437_v30 = vunpack.c.l.bf16 %v412_v29  ;;  %v438_v31 = vunpack.c.h.bf16 %v412_v29  ;;  %v496_v50 = vld [vmem:[%s1082_s12 + $0x4] sm:$0xff]  ;;  %vm980_vm0 = vmmov 0  }
  0xaa   : > { %v416_v27 = vsel %vm415_vm2, 65537, %v971_v24  ;;  %vm452_vm3 = vmpackc.low %vm408_vm1, %vm408_vm1  ;;  %v537_v6 = vunpack.c.l.bf16 %v496_v50  ;;  %v538_v7 = vunpack.c.h.bf16 %v496_v50  ;;  %832 = vmatprep.mubr.msk.bf16.mxu0 %vm980_vm0, %v979_v37  ;;  %vm445_vm1 = vcmask 130048  }
  0xab   : > { %417 = vrot.lane.b32.xlu0 %v416_v27, %s972_s30  ;;  %474 = vrot.lane.b32.xlu1 %v416_v27, %s973_s10  ;;  %v453_v28 = vsel %vm452_vm3, 65537, %v971_v24  ;;  %v889_v32 = vpack.i.bf16 %v438_v31, %v437_v30  ;;  %vm545_vm2 = vcmask 916480   ;;  %vm594_vm3 = vcmask 1043456  }
  0xac   : > { %v914_v14 = vpack.i.bf16 %v538_v7, %v537_v6 }
  0xaf   : > { %454 = vrot.lane.b32.xlu0 %v453_v28, %s974_s13  ;;  %497 = vrot.lane.b32.xlu1 %v453_v28, %s975_s24 }
  0xb3   : > { %517 = vrot.lane.b32.xlu0 %v416_v27, %s976_s14  ;;  %550 = vrot.lane.b32.xlu1 %v453_v28, %s977_s15 }
  0xb7   : > { %890 = vrot.lane.b32.xlu1 %v889_v32, %s978_s16  ;;  %v493_v32 = vld [vmem:[%s1082_s12 + $0x4] sm:$0xf] }
 0x11d   : > { %v418_v33 = vpop.permute.xlu0 %417  ;;  %v475_v34 = vpop.permute.xlu1 %474 }
 0x11e   : > { %v419_v35 = vrot.slane %v418_v33, 4  ;;  %v476_v36 = vrot.slane %v475_v34, 4 }
 0x120   : > { %v421_v38 = vsel %vm420_vm4, %v419_v35, %v418_v33  ;;  %v478_v39 = vsel %vm477_vm5, %v476_v36, %v475_v34 }
 0x121   : > { %vm422_vm6 = vcmp.ne.s16.totalorder %v421_v38, 0  ;;  %vm479_vm7 = vcmp.ne.s16.totalorder %v478_v39, 0  ;;  %v455_v40 = vpop.permute.xlu0 %454  ;;  %v498_v41 = vpop.permute.xlu1 %497  ;;  %v494_v39 = vunpack.c.l.bf16 %v493_v32 }
 0x122   : > { %v423_v42 = vsel %vm422_vm6, %v412_v29, 0  ;;  %v480_v43 = vsel %vm479_vm7, %v412_v29, 0  ;;  %v456_v44 = vrot.slane %v455_v40, 4  ;;  %v499_v45 = vrot.slane %v498_v41, 4 }
 0x123   : > { %v424_v46 = vunpack.c.l.bf16 %v423_v42  ;;  %v425_v47 = vunpack.c.h.bf16 %v423_v42  ;;  %v481_v48 = vunpack.c.l.bf16 %v480_v43  ;;  %v482_v49 = vunpack.c.h.bf16 %v480_v43 }
 0x124   : > { %v458_v51 = vsel %vm457_vm8, %v456_v44, %v455_v40  ;;  %v501_v52 = vsel %vm489_vm9, %v499_v45, %v498_v41 }
 0x125   : > { %vm459_vm12 = vcmp.ne.s16.totalorder %v458_v51, 0  ;;  %vm502_vm13 = vcmp.ne.s16.totalorder %v501_v52, 0  ;;  %v518_v53 = vpop.permute.xlu0 %517  ;;  %v894_v54 = vpack.i.bf16 %v425_v47, %v424_v46  ;;  %v904_v55 = vpack.i.bf16 %v482_v49, %v481_v48  ;;  %v551_v56 = vpop.permute.xlu1 %550 }
 0x126   : > { %v460_v57 = vsel %vm459_vm12, %v412_v29, 0  ;;  %v503_v58 = vsel %vm502_vm13, %v496_v50, 0  ;;  %v519_v59 = vrot.slane %v518_v53, 4  ;;  %v552_v60 = vrot.slane %v551_v56, 4 }
 0x127   : > { %v461_v61 = vunpack.c.l.bf16 %v460_v57  ;;  %v462_v62 = vunpack.c.h.bf16 %v460_v57  ;;  %895 = vrot.lane.b32.xlu0 %v894_v54, %s977_s15  ;;  %905 = vrot.lane.b32.xlu1 %v904_v55, %s975_s24  ;;  %v504_v63 = vunpack.c.l.bf16 %v503_v58  ;;  %v505_v2 = vunpack.c.h.bf16 %v503_v58  ;;  %v569_v58 = vld [vmem:[%s1143_s4] sm:$0xf] }
 0x128   : > { %v521_v0 = vsel %vm469_vm10, %v519_v59, %v518_v53  ;;  %v554_v1 = vsel %vm432_vm11, %v552_v60, %v551_v56 }
 0x129   : > { %vm522_vm14 = vcmp.ne.s16.totalorder %v521_v0, 0  ;;  %vm555_vm15 = vcmp.ne.s16.totalorder %v554_v1, 0  ;;  %v899_v3 = vpack.i.bf16 %v462_v62, %v461_v61  ;;  %v909_v12 = vpack.i.bf16 %v505_v2, %v504_v63  ;;  %v891_v17 = vpop.permute.xlu1 %890 }
 0x12a   : > { %v523_v4 = vsel %vm522_vm14, %v496_v50, 0  ;;  %v556_v5 = vsel %vm555_vm15, %v496_v50, 0  ;;  %v893_v18 = vunpack.i.h.bf16 %v891_v17  ;;  %v892_v19 = vunpack.i.l.bf16 %v891_v17 }
 0x12b   : > { %v524_v8 = vunpack.c.l.bf16 %v523_v4  ;;  %v525_v9 = vunpack.c.h.bf16 %v523_v4  ;;  %v557_v10 = vunpack.c.l.bf16 %v556_v5  ;;  %v558_v11 = vunpack.c.h.bf16 %v556_v5  ;;  %900 = vrot.lane.b32.xlu0 %v899_v3, %s976_s14 }
 0x12c   : > { %v446_v24 = vsel %vm445_vm1, %v892_v19, %v893_v18 }
 0x12d   : > { %v919_v13 = vpack.i.bf16 %v525_v9, %v524_v8  ;;  %v924_v15 = vpack.i.bf16 %v558_v11, %v557_v10 }
 0x12f   : > { %910 = vrot.lane.b32.xlu0 %v909_v12, %s973_s10  ;;  %920 = vrot.lane.b32.xlu1 %v919_v13, %s974_s13 }
 0x133   : > { %915 = vrot.lane.b32.xlu0 %v914_v14, %s981_s17  ;;  %925 = vrot.lane.b32.xlu1 %v924_v15, %s972_s30 }
 0x137   : > { %587 = vperm.xlu0 %929, %v584_v16  }
 0x199   : > { %v896_v20 = vpop.permute.xlu0 %895  ;;  %v906_v21 = vpop.permute.xlu1 %905 }
 0x19a   : > { %v898_v22 = vunpack.i.h.bf16 %v896_v20  ;;  %v897_v23 = vunpack.i.l.bf16 %v896_v20  ;;  %v908_v25 = vunpack.i.h.bf16 %v906_v21  ;;  %v907_v26 = vunpack.i.l.bf16 %v906_v21 }
 0x19c   : > { %v433_v27 = vsel %vm432_vm11, %v897_v23, %v898_v22  ;;  %v490_v34 = vsel %vm489_vm9, %v907_v26, %v908_v25 }
 0x19d   : > { %v901_v28 = vpop.permute.xlu0 %900  ;;  %v579_v29 = vpack.c.bf16 %v446_v24, %v433_v27 }
 0x19e   : > { %v903_v30 = vunpack.i.h.bf16 %v901_v28  ;;  %v902_v31 = vunpack.i.l.bf16 %v901_v28 }
 0x19f   : > { %823 = vmatpush3.bf16.msra.mxu0 %v579_v29 }
 0x1a0   : > { %824 = vmatprep.subr.bf16.mxu0 %v979_v37  ;;  %v470_v33 = vsel %vm469_vm10, %v902_v31, %v903_v30 }
 0x1a1   : > { %v911_v35 = vpop.permute.xlu0 %910  ;;  %v921_v36 = vpop.permute.xlu1 %920  ;;  %v580_v38 = vpack.c.bf16 %v490_v34, %v470_v33 }
 0x1a2   : > { %v913_v40 = vunpack.i.h.bf16 %v911_v35  ;;  %v912_v41 = vunpack.i.l.bf16 %v911_v35  ;;  %v923_v42 = vunpack.i.h.bf16 %v921_v36  ;;  %v922_v43 = vunpack.i.l.bf16 %v921_v36 }
 0x1a3   : > { %825 = vmatpush3.bf16.msra.mxu0 %v580_v38 }
 0x1a4   : > { %826 = vmatprep.subr.bf16.mxu0 %v979_v37  ;;  %v513_v44 = vsel %vm477_vm5, %v912_v41, %v913_v40  ;;  %v533_v52 = vsel %vm457_vm8, %v922_v43, %v923_v42  ;;  %vm590_vm5 = vcmask 588800  }
 0x1a5   : > { %v916_v45 = vpop.permute.xlu0 %915  ;;  %v926_v46 = vpop.permute.xlu1 %925  ;;  %v581_v47 = vpack.c.bf16 %v513_v44, %v494_v39 }
 0x1a6   : > { %v918_v48 = vunpack.i.h.bf16 %v916_v45  ;;  %v917_v49 = vunpack.i.l.bf16 %v916_v45  ;;  %v928_v50 = vunpack.i.h.bf16 %v926_v46  ;;  %v927_v51 = vunpack.i.l.bf16 %v926_v46 }
 0x1a7   : > { %827 = vmatpush3.bf16.msra.mxu0 %v581_v47 }
 0x1a8   : > { %828 = vmatprep.subr.bf16.mxu0 %v979_v37  ;;  %v546_v53 = vsel %vm545_vm2, %v917_v49, %v918_v48  ;;  %v566_v54 = vsel %vm420_vm4, %v927_v51, %v928_v50  ;;  %vm646_vm4 = vcmask 15360  }
 0x1a9   : > { %v582_v55 = vpack.c.bf16 %v546_v53, %v533_v52  ;;  %v583_v56 = vpack.c.bf16 %v566_v54, %v566_v54 }
 0x1ab   : > { %829 = vmatpush3.bf16.msra.mxu0 %v582_v55  ;;  %v596_v57 = vsel %vm594_vm3, %v583_v56, 0 }
 0x1ac   : > { %830 = vmatprep.subr.bf16.mxu0 %v979_v37 }
 0x1af   : > { %831 = vmatpush3.bf16.msra.mxu0 %v596_v57 }
 0x1b2   : > { %833 = vmatmul.mubr.msk.bf16.vlgmr.msra.gmra.mrb[0].mxu0 %vm590_vm5, %v569_v58 }
 0x1b6   : > { %v588_v59 = vpop.permute.xlu0 %587 }
 0x285   : > { %v632_v60 = vpop.f32.mrb[0].mxu0 }
 0x286   : > { %v633_v61 = vadd.f32 %v632_v60, %v588_v59  ;;  %v834_v62 = vpop.f32.mrb[1].mxu0 }
 0x287   : > { %v635_v63 = vpop.f32.mrb[2].mxu0 }
 0x288   : > { %v638_v0 = vpack.c.bf16 %v633_v61, %v633_v61  ;;  %640 = vadd.xlane.f32.xlu1 %v633_v61  ;;  %v835_v1 = vpop.f32.mrb[3].mxu0  ;;  %v642_v2 = vmul.f32 %v633_v61, %v633_v61 }
 0x28a   : > { %639 = vst [vmem:[%s1065_s23] sm:$0xf] %v638_v0  ;;  %643 = vadd.xlane.f32.xlu0 %v642_v2 }
 0x315   : > { %v641_v37 = vpop.xlane.xlu1 %640 }
 0x317   : > { %v644_v3 = vpop.xlane.xlu0 %643 }
 0x318   : > { %v645_v4 = vsel %vm489_vm9, %v641_v37, %v644_v3 }
 0x319   : > { %647 = vst.msk [vmem:[%s1070_s27] sm:$0xff] %vm646_vm4, %v645_v4 }
 0x31a PF: > { %s18_s28 = sadd.s32 1, %s968_s28   ;;  %s1151_s25 = sld [smem:[#allocation4_spill]] }
 0x31b   : > { %p15_p8 = scmp.ge.s32.totalorder %s18_s28, 6   ;;  %s1152_s22 = sld [smem:[#allocation5_spill]] }
 0x31c   : > { %s1153_s27 = sld [smem:[#allocation6_spill]]  ;;  %s1154_s24 = smov %s960_s26 }
 0x31d   :  { %17 = sbr.rel (!%p15_p8) target bundleno = 3 (0x3), region = 95 }
 0x321   : > { %s1155_s26 = smov %s1152_s22 }

// kernel: _lambda_.4
= control target key start
LH: loop header
LB: loop body
LE: loop exit
PB: predicated region body
PF: predicated region fallthrough
CT: control target
= control target key end

     0   :  { %s867_s15 = smov 0   ;;  %s869_s16 = smov 0   ;;  %s975_s0 = inlined_call_operand.vmem [shape: f32[2,8,256], index: 0, kind: input, shape index: {}]   ;;  %s976_s1 = inlined_call_operand.vmem [shape: bf16[8,72], index: 1, kind: input, shape index: {}]   ;;  %s977_s2 = inlined_call_operand.vmem [shape: f32[8,1], index: 2, kind: input, shape index: {}]   ;;  %s978_s3 = inlined_call_operand.vmem [shape: bf16[2,8,256], index: 3, kind: output, shape index: {0}]   ;;  %s979_s4 = inlined_call_operand.vmem [shape: f32[2,2,8,2], index: 4, kind: output, shape index: {1}]  }
   0x1   :  { %s871_s17 = smov 0   ;;  %s873_s18 = smov 0  }
   0x2   :  { %s875_s19 = smov 0  }
   0x3 LB: > { %s24_s20 = sadd.s32 1, %s820_s17  ;;  %s27_s21 = sadd.s32 1, %s824_s18  ;;  %s828_s19 = sphi %s875_s19, %s15_s19   ;;  %s824_s18 = sphi %s873_s18, %s983_s18   ;;  %s820_s17 = sphi %s871_s17, %s982_s17   ;;  %s816_s16 = sphi %s869_s16, %s981_s16   ;;  %s812_s15 = sphi %s867_s15, %s980_s15  }
   0x4   : > { %p25_p0 = scmp.ge.s32.totalorder %s24_s20, 2  ;;  %p657_p1 = scmp.ge.s32.totalorder %s828_s19, 1 }
   0x5   : > { %p181_p2 = scmp.lt.s32.totalorder %s828_s19, 5 }
   0x6   : > { %s985_s20 = smov (%p25_p0, %s24_s20), 0  ;;  %s987_s21 = smov (!%p25_p0, %s27_s21), %s824_s18 }
   0x7   : > { %p182_p3 = pnand %p657_p1, %p181_p2  ;;  %p29_p4 = scmp.ge.s32.totalorder %s987_s21, 2 }
   0x8   : > { %p218_p5 = scmp.lt.s32.totalorder (!%p182_p3), %s816_s16, 1  ;;  %p225_p6 = scmp.lt.s32.totalorder (!%p182_p3), %s812_s15, 1 }
   0x9   : > { %s989_s21 = smov (%p29_p4, %s987_s21), 0  ;;  %185 = sbr.rel (%p182_p3) target bundleno = 658 (0x292), region = 32 }
   0xa   : > { %p664_p7 = scmp.ne.s32.totalorder (!%p182_p3), %s812_s15, 0 }
  0x10   : > { %s991_s16 = smov (!%p218_p5, %s816_s16), 1  ;;  %245 = sbr.rel (%p664_p7) target bundleno = 26 (0x1a), region = 36 }
  0x11   : > { %s226_s22 = scalar_select %p225_p6, %s812_s15, 1 }
  0x12   : > { %s673_s23 = sshll.u32 %s991_s16, 4  ;;  %s660_s24 = sshll.u32 %s991_s16, 1  ;;  %v830_v5 = vmov (!%p664_p7), 0  }
  0x13   : > { %s222_s27 = scalar_lea.vmem %s975_s0, %s673_s23  ;;  %s228_s28 = sadd.s32 %s660_s24, %s226_s22  ;;  %v668_v6 = vcombine.low (!%p664_p7), %v830_v5, %v830_v5 }
  0x14   : > { %s661_s29 = sshll.u32 %s228_s28, 2  ;;  %s663_s30 = sshll.u32 %s228_s28, 3  ;;  %v246_v0 = vld [vmem:[%s222_s27] sm:$0xff] (!%p664_p7)  ;;  %v247_v1 = vld [vmem:[%s222_s27 + $0x8] sm:$0xff] (!%p664_p7) }
  0x15   : > { %s907_s7 = scalar_lea.vmem %s978_s3, %s661_s29  ;;  %s912_s10 = scalar_lea.vmem %s979_s4, %s663_s30  ;;  %v248_v2 = vpack.c.bf16 (!%p664_p7), %v246_v0, %v246_v0  ;;  %v674_v3 = vpack.c.bf16 (!%p664_p7), %v247_v1, %v247_v1  ;;  %v675_v4 = vpack.c.bf16 (!%p664_p7), %v247_v1, %v246_v0  ;;  %268 = vst [vmem:[#allocation2 + $0x14] sm:$0xf] (!%p664_p7), %v668_v6 }
  0x17   : > { %v665_v7 = vcombine.low %v830_v5, %v248_v2  ;;  %261 = vst [vmem:[#allocation2 + $0x8] sm:$0xf] %v674_v3  ;;  %267 = vst [vmem:[#allocation2 + $0xc] sm:$0xff] %v675_v4 }
  0x19   : > { %260 = vst [vmem:[#allocation2] sm:$0xff] %v665_v7 }
  0x1a PF: > { %v269_v8 = vlaneseq  ;;  %v831_v9 = vmov 0   ;;  %s676_s11 = smul.u32 12, %s812_s15  ;;  %s832_s12 = smov 111   ;;  %vm296_vm4 = vcmask 908288   ;;  %vm353_vm5 = vcmask 1039360   ;;  %v460_v1 = vld [vmem:[%s977_s2] sm:$0xff] }
  0x1b   : > { %789 = vset.pattern.permute.xlu0 %v831_v9  ;;  %s833_s13 = smov 127   ;;  %s834_s16 = smov 113   ;;  %v839_v22 = vmov 0.0   ;;  %vm333_vm8 = vcmask 924672   ;;  %vm365_vm9 = vcmask 7168   ;;  %vm345_vm10 = vcmask 121856  }
  0x1c   : > { %v270_v10 = vand.u32 127, %v269_v8  ;;  %s918_s14 = scalar_lea.vmem [#allocation2], %s676_s11  ;;  %s835_s15 = smov 1   ;;  %683 = vmatprep.subr.bf16.mxu0 %v839_v22  ;;  %vm308_vm11 = vcmask 138240  }
  0x1d   : > { %s836_s22 = smov 15   ;;  %s837_s23 = smov 17  }
  0x1e   : > { %v275_v11 = vand.u32 15, %v270_v10  ;;  %s838_s24 = smov 16   ;;  %s841_s25 = smov 112  }
  0x20   : > { %vm283_vm0 = vcmp.gt.s32.totalorder %v275_v11, 0  ;;  %vm284_vm1 = vcmp.lt.s32.totalorder %v275_v11, 15  ;;  %v288_v14 = vld [vmem:[%s918_s14] sm:$0xff] }
  0x21   : > { %vm291_vm2 = vmpackc.low %vm283_vm0, %vm283_vm0  ;;  %v313_v15 = vunpack.c.l.bf16 %v288_v14  ;;  %v314_v16 = vunpack.c.h.bf16 %v288_v14  ;;  %v372_v35 = vld [vmem:[%s918_s14 + $0x4] sm:$0xff]  ;;  %vm840_vm0 = vmmov 0  }
  0x22   : > { %v292_v12 = vsel %vm291_vm2, 65537, %v831_v9  ;;  %vm328_vm3 = vmpackc.low %vm284_vm1, %vm284_vm1  ;;  %v413_v55 = vunpack.c.l.bf16 %v372_v35  ;;  %v414_v56 = vunpack.c.h.bf16 %v372_v35  ;;  %693 = vmatprep.mubr.msk.bf16.mxu0 %vm840_vm0, %v839_v22  ;;  %vm321_vm1 = vcmask 130048  }
  0x23   : > { %293 = vrot.lane.b32.xlu0 %v292_v12, %s832_s12  ;;  %350 = vrot.lane.b32.xlu1 %v292_v12, %s833_s13  ;;  %v329_v13 = vsel %vm328_vm3, 65537, %v831_v9  ;;  %v749_v17 = vpack.i.bf16 %v314_v16, %v313_v15  ;;  %vm421_vm2 = vcmask 916480   ;;  %vm470_vm3 = vcmask 1043456  }
  0x24   : > { %v774_v63 = vpack.i.bf16 %v414_v56, %v413_v55 }
  0x27   : > { %330 = vrot.lane.b32.xlu0 %v329_v13, %s834_s16  ;;  %373 = vrot.lane.b32.xlu1 %v329_v13, %s835_s15 }
  0x2b   : > { %393 = vrot.lane.b32.xlu0 %v292_v12, %s836_s22  ;;  %426 = vrot.lane.b32.xlu1 %v329_v13, %s837_s23 }
  0x2f   : > { %750 = vrot.lane.b32.xlu1 %v749_v17, %s838_s24  ;;  %v369_v17 = vld [vmem:[%s918_s14 + $0x4] sm:$0xf] }
  0x95   : > { %v294_v18 = vpop.permute.xlu0 %293  ;;  %v351_v19 = vpop.permute.xlu1 %350 }
  0x96   : > { %v295_v20 = vrot.slane %v294_v18, 4  ;;  %v352_v21 = vrot.slane %v351_v19, 4 }
  0x98   : > { %v297_v23 = vsel %vm296_vm4, %v295_v20, %v294_v18  ;;  %v354_v24 = vsel %vm353_vm5, %v352_v21, %v351_v19 }
  0x99   : > { %vm298_vm6 = vcmp.ne.s16.totalorder %v297_v23, 0  ;;  %vm355_vm7 = vcmp.ne.s16.totalorder %v354_v24, 0  ;;  %v331_v25 = vpop.permute.xlu0 %330  ;;  %v374_v26 = vpop.permute.xlu1 %373  ;;  %v370_v24 = vunpack.c.l.bf16 %v369_v17 }
  0x9a   : > { %v299_v27 = vsel %vm298_vm6, %v288_v14, 0  ;;  %v356_v28 = vsel %vm355_vm7, %v288_v14, 0  ;;  %v332_v29 = vrot.slane %v331_v25, 4  ;;  %v375_v30 = vrot.slane %v374_v26, 4 }
  0x9b   : > { %v300_v31 = vunpack.c.l.bf16 %v299_v27  ;;  %v301_v32 = vunpack.c.h.bf16 %v299_v27  ;;  %v357_v33 = vunpack.c.l.bf16 %v356_v28  ;;  %v358_v34 = vunpack.c.h.bf16 %v356_v28 }
  0x9c   : > { %v334_v36 = vsel %vm333_vm8, %v332_v29, %v331_v25  ;;  %v377_v37 = vsel %vm365_vm9, %v375_v30, %v374_v26 }
  0x9d   : > { %vm335_vm12 = vcmp.ne.s16.totalorder %v334_v36, 0  ;;  %vm378_vm13 = vcmp.ne.s16.totalorder %v377_v37, 0  ;;  %v394_v38 = vpop.permute.xlu0 %393  ;;  %v754_v39 = vpack.i.bf16 %v301_v32, %v300_v31  ;;  %v764_v40 = vpack.i.bf16 %v358_v34, %v357_v33  ;;  %v427_v41 = vpop.permute.xlu1 %426 }
  0x9e   : > { %v336_v42 = vsel %vm335_vm12, %v288_v14, 0  ;;  %v379_v43 = vsel %vm378_vm13, %v372_v35, 0  ;;  %v395_v44 = vrot.slane %v394_v38, 4  ;;  %v428_v45 = vrot.slane %v427_v41, 4 }
  0x9f   : > { %v337_v46 = vunpack.c.l.bf16 %v336_v42  ;;  %v338_v47 = vunpack.c.h.bf16 %v336_v42  ;;  %755 = vrot.lane.b32.xlu0 %v754_v39, %s837_s23  ;;  %765 = vrot.lane.b32.xlu1 %v764_v40, %s835_s15  ;;  %v380_v48 = vunpack.c.l.bf16 %v379_v43  ;;  %v381_v51 = vunpack.c.h.bf16 %v379_v43  ;;  %v445_v43 = vld [vmem:[%s976_s1] sm:$0xf] }
  0xa0   : > { %v397_v49 = vsel %vm345_vm10, %v395_v44, %v394_v38  ;;  %v430_v50 = vsel %vm308_vm11, %v428_v45, %v427_v41 }
  0xa1   : > { %vm398_vm14 = vcmp.ne.s16.totalorder %v397_v49, 0  ;;  %vm431_vm15 = vcmp.ne.s16.totalorder %v430_v50, 0  ;;  %v759_v52 = vpack.i.bf16 %v338_v47, %v337_v46  ;;  %v769_v61 = vpack.i.bf16 %v381_v51, %v380_v48  ;;  %v751_v2 = vpop.permute.xlu1 %750 }
  0xa2   : > { %v399_v53 = vsel %vm398_vm14, %v372_v35, 0  ;;  %v432_v54 = vsel %vm431_vm15, %v372_v35, 0  ;;  %v753_v3 = vunpack.i.h.bf16 %v751_v2  ;;  %v752_v4 = vunpack.i.l.bf16 %v751_v2 }
  0xa3   : > { %v400_v57 = vunpack.c.l.bf16 %v399_v53  ;;  %v401_v58 = vunpack.c.h.bf16 %v399_v53  ;;  %v433_v59 = vunpack.c.l.bf16 %v432_v54  ;;  %v434_v60 = vunpack.c.h.bf16 %v432_v54  ;;  %760 = vrot.lane.b32.xlu0 %v759_v52, %s836_s22 }
  0xa4   : > { %v322_v9 = vsel %vm321_vm1, %v752_v4, %v753_v3 }
  0xa5   : > { %v779_v62 = vpack.i.bf16 %v401_v58, %v400_v57  ;;  %v784_v0 = vpack.i.bf16 %v434_v60, %v433_v59 }
  0xa7   : > { %770 = vrot.lane.b32.xlu0 %v769_v61, %s833_s13  ;;  %780 = vrot.lane.b32.xlu1 %v779_v62, %s834_s16 }
  0xab   : > { %775 = vrot.lane.b32.xlu0 %v774_v63, %s841_s25  ;;  %785 = vrot.lane.b32.xlu1 %v784_v0, %s832_s12 }
  0xaf   : > { %463 = vperm.xlu0 %789, %v460_v1  }
 0x111   : > { %v756_v5 = vpop.permute.xlu0 %755  ;;  %v766_v6 = vpop.permute.xlu1 %765 }
 0x112   : > { %v758_v7 = vunpack.i.h.bf16 %v756_v5  ;;  %v757_v8 = vunpack.i.l.bf16 %v756_v5  ;;  %v768_v10 = vunpack.i.h.bf16 %v766_v6  ;;  %v767_v11 = vunpack.i.l.bf16 %v766_v6 }
 0x114   : > { %v309_v12 = vsel %vm308_vm11, %v757_v8, %v758_v7  ;;  %v366_v19 = vsel %vm365_vm9, %v767_v11, %v768_v10 }
 0x115   : > { %v761_v13 = vpop.permute.xlu0 %760  ;;  %v455_v14 = vpack.c.bf16 %v322_v9, %v309_v12 }
 0x116   : > { %v763_v15 = vunpack.i.h.bf16 %v761_v13  ;;  %v762_v16 = vunpack.i.l.bf16 %v761_v13 }
 0x117   : > { %684 = vmatpush3.bf16.msra.mxu0 %v455_v14 }
 0x118   : > { %685 = vmatprep.subr.bf16.mxu0 %v839_v22  ;;  %v346_v18 = vsel %vm345_vm10, %v762_v16, %v763_v15 }
 0x119   : > { %v771_v20 = vpop.permute.xlu0 %770  ;;  %v781_v21 = vpop.permute.xlu1 %780  ;;  %v456_v23 = vpack.c.bf16 %v366_v19, %v346_v18 }
 0x11a   : > { %v773_v25 = vunpack.i.h.bf16 %v771_v20  ;;  %v772_v26 = vunpack.i.l.bf16 %v771_v20  ;;  %v783_v27 = vunpack.i.h.bf16 %v781_v21  ;;  %v782_v28 = vunpack.i.l.bf16 %v781_v21 }
 0x11b   : > { %686 = vmatpush3.bf16.msra.mxu0 %v456_v23 }
 0x11c   : > { %687 = vmatprep.subr.bf16.mxu0 %v839_v22  ;;  %v389_v29 = vsel %vm353_vm5, %v772_v26, %v773_v25  ;;  %v409_v37 = vsel %vm333_vm8, %v782_v28, %v783_v27  ;;  %vm466_vm5 = vcmask 588800  }
 0x11d   : > { %v776_v30 = vpop.permute.xlu0 %775  ;;  %v786_v31 = vpop.permute.xlu1 %785  ;;  %v457_v32 = vpack.c.bf16 %v389_v29, %v370_v24 }
 0x11e   : > { %v778_v33 = vunpack.i.h.bf16 %v776_v30  ;;  %v777_v34 = vunpack.i.l.bf16 %v776_v30  ;;  %v788_v35 = vunpack.i.h.bf16 %v786_v31  ;;  %v787_v36 = vunpack.i.l.bf16 %v786_v31 }
 0x11f   : > { %688 = vmatpush3.bf16.msra.mxu0 %v457_v32 }
 0x120   : > { %689 = vmatprep.subr.bf16.mxu0 %v839_v22  ;;  %v422_v38 = vsel %vm421_vm2, %v777_v34, %v778_v33  ;;  %v442_v39 = vsel %vm296_vm4, %v787_v36, %v788_v35  ;;  %vm522_vm4 = vcmask 15360  }
 0x121   : > { %v458_v40 = vpack.c.bf16 %v422_v38, %v409_v37  ;;  %v459_v41 = vpack.c.bf16 %v442_v39, %v442_v39 }
 0x123   : > { %690 = vmatpush3.bf16.msra.mxu0 %v458_v40  ;;  %v472_v42 = vsel %vm470_vm3, %v459_v41, 0 }
 0x124   : > { %691 = vmatprep.subr.bf16.mxu0 %v839_v22 }
 0x127   : > { %692 = vmatpush3.bf16.msra.mxu0 %v472_v42 }
 0x12a   : > { %694 = vmatmul.mubr.msk.bf16.vlgmr.msra.gmra.mrb[0].mxu0 %vm466_vm5, %v445_v43 }
 0x12e   : > { %v464_v44 = vpop.permute.xlu0 %463 }
 0x1fd   : > { %v508_v45 = vpop.f32.mrb[0].mxu0 }
 0x1fe   : > { %v509_v46 = vadd.f32 %v508_v45, %v464_v44  ;;  %v695_v47 = vpop.f32.mrb[1].mxu0 }
 0x1ff   : > { %v511_v48 = vpop.f32.mrb[2].mxu0 }
 0x200   : > { %v514_v49 = vpack.c.bf16 %v509_v46, %v509_v46  ;;  %516 = vadd.xlane.f32.xlu1 %v509_v46  ;;  %v696_v50 = vpop.f32.mrb[3].mxu0  ;;  %v518_v51 = vmul.f32 %v509_v46, %v509_v46 }
 0x202   : > { %515 = vst [vmem:[%s907_s7] sm:$0xf] %v514_v49  ;;  %519 = vadd.xlane.f32.xlu0 %v518_v51 }
 0x28d   : > { %v517_v22 = vpop.xlane.xlu1 %516 }
 0x28f   : > { %v520_v52 = vpop.xlane.xlu0 %519 }
 0x290   : > { %v521_v53 = vsel %vm365_vm9, %v517_v22, %v520_v52 }
 0x291   : > { %523 = vst.msk [vmem:[%s912_s10] sm:$0xff] %vm522_vm4, %v521_v53 }
 0x292 PF: > { %s15_s19 = sadd.s32 1, %s828_s19   ;;  %s980_s15 = smov %s820_s17 }
 0x293   : > { %p12_p8 = scmp.ge.s32.totalorder %s15_s19, 6   ;;  %s981_s16 = smov %s824_s18 }
 0x294   : > { %s982_s17 = smov %s985_s20  ;;  %s983_s18 = smov %s989_s21 }
 0x295   :  { %14 = sbr.rel (!%p12_p8) target bundleno = 3 (0x3), region = 80 }

</bundles_post_ra>
